<compile_context>
chip_gen: v7x
topology: tpu7x:2x2x1
jax: 0.10.0
libtpu: 0.0.40
codegen_flags: <defaults>
</compile_context>

<pallas_src>
import jax
import jax.numpy as jnp
from jax import lax
from jax.experimental import pallas as pl
from jax.experimental.pallas import tpu as pltpu

# ----------------------------- model dimensions ------------------------------
B = 8            # batch
T = 8            # sequence length
INPUT_SIZE = 16  # LSTM input_size
HIDDEN = 32      # LSTM hidden_size (4*32*1 = 128 matches Classifier in_features)
NUM_LAYERS = 2   # stacked LSTM layers (hardwired in the wavefront below)
FC_OUT = 128     # nn.Linear(hidden_size, 128)
NUM_CLASSES = 23 # Classifier final Linear out_features


# ------------------------------- Pallas kernel --------------------------------
def lstm_mlp_kernel(x_ref, wih0_ref, wrec_ref, wtail_ref, bias_ref, out_ref):
    """x_ref: (T*B, I) f32, time-major.
    wih0_ref: (I, 4H) bf16 (i/f/o cols pre-scaled by 0.5).
    wrec_ref: (2H, 8H) bf16 packed recurrent weight [[whh0, wih1],[0, whh1]].
    wtail_ref: (288, 128) bf16 = [fc∘mlp1 fused (32); mlp2 (128); mlp3 padded (128)].
    bias_ref: (5, 128) f32 = [b0; b1; b_fc∘mlp1; b_mlp2; b_mlp3 padded].
    """
    H = HIDDEN
    bf16 = jnp.bfloat16
    f32 = jnp.float32

    bslab = bias_ref[...]                      # (5, 128) f32
    b0 = bslab[0:1, :]                         # (1, 4H)  (pre-scaled)
    b1 = bslab[1:2, :]
    b_f1 = bslab[2:3, :]
    b_m2 = bslab[3:4, :]
    b_m3 = bslab[4:5, 0:NUM_CLASSES]           # (1, 23)

    # ---- hoisted layer-0 input projection: ONE (T*B, I) @ (I, 4H) matmul ----
    gates0_all = (jnp.dot(x_ref[...].astype(bf16), wih0_ref[...],
                          preferred_element_type=f32)
                  + b0)                        # bias (b_ih + b_hh) folded in
    gates0_all = gates0_all.reshape(T, B, 4 * H)   # time-major: [t] = whole (8,128)

    wrec = wrec_ref[...]                       # (2H, 8H) bf16

    # Gate-activation constants (half-angle trick), hoisted out of the loop.
    # PyTorch gate order i, f, g, o; i/f/o pre-activations were pre-scaled by 0.5
    # so sigmoid(x) = 0.5*tanh(x/2) + 0.5 needs only one tanh per gate vector.
    lane = lax.broadcasted_iota(jnp.int32, (B, 4 * H), 1)
    is_cell = (lane >= 2 * H) & (lane < 3 * H)
    g_scale = jnp.where(is_cell, 1.0, 0.5).astype(f32)
    g_shift = jnp.where(is_cell, 0.0, 0.5).astype(f32)
    b1b = jnp.broadcast_to(b1, (B, 4 * H))     # hoisted broadcast (not CSE'd otherwise)

    def cell_update(g, c):
        a = jnp.tanh(g) * g_scale + g_shift    # one full-vreg EUP push
        i_g = a[:, 0:H]
        f_g = a[:, H:2 * H]
        g_g = a[:, 2 * H:3 * H]
        o_g = a[:, 3 * H:4 * H]
        c_new = f_g * c + i_g * g_g
        return o_g * jnp.tanh(c_new), c_new

    zeros = jnp.zeros((B, H), f32)
    h0, c0, h1, c1 = zeros, zeros, zeros, zeros

    # ---- wavefront recurrence: step s does layer0(t=s) and layer1(t=s-1) ----
    # (s = 0 needs no matmul: all recurrent state is zero.)
    for s in range(T + 1):
        if s == 0:
            h0, c0 = cell_update(gates0_all[0], c0)
            continue
        xh = jnp.concatenate([h0, h1], axis=1).astype(bf16)        # (B, 2H)
        r = jnp.dot(xh, wrec, preferred_element_type=f32)          # (B, 8H) single push
        if s < T:
            # layer 0 at time s: precomputed input gates + recurrent term
            h0, c0 = cell_update(gates0_all[s] + r[:, 0:4 * H], c0)
        # layer 1 at time s-1: x-projection (from h0_{s-1}) + recurrent term
        h1, c1 = cell_update(r[:, 4 * H:8 * H] + b1b, c1)

    # ---- tail: (fc ∘ mlp1) -> ReLU -> mlp2 -> ReLU -> mlp3 -> ReLU -> softmax ----
    w_f1 = wtail_ref[0:32, :]                  # (H, 128)  fc fused into mlp1
    w_2 = wtail_ref[32:160, :]                 # (128, 128)
    w_3 = wtail_ref[160:288, :]                # (128, 128), cols >= 23 are zero

    z = jnp.maximum(jnp.dot(h1.astype(bf16), w_f1, preferred_element_type=f32) + b_f1, 0.0)
    z = jnp.maximum(jnp.dot(z.astype(bf16), w_2, preferred_element_type=f32) + b_m2, 0.0)
    z3 = jnp.dot(z.astype(bf16), w_3, preferred_element_type=f32)[:, 0:NUM_CLASSES] + b_m3
    z3 = jnp.maximum(z3, 0.0)

    z3 = z3 - jnp.max(z3, axis=1, keepdims=True)
    e = jnp.exp(z3)
    out_ref[...] = e / jnp.sum(e, axis=1, keepdims=True)   # exact normalization


# --------------------------------- wrapper ------------------------------------
@jax.jit
def inception_time_monitor_lstm(x, kp):
    """x: (B, T, INPUT_SIZE), batch_first (PyTorch convention). Returns (B, 23)."""
    # Time-major flatten so the hoisted gate precompute is already time-major.
    x_tm = jnp.transpose(x, (1, 0, 2)).reshape(T * B, INPUT_SIZE)
    vmem = pl.BlockSpec(memory_space=pltpu.MemorySpace.VMEM)
    out = pl.pallas_call(
        lstm_mlp_kernel,
        out_shape=jax.ShapeDtypeStruct((B, NUM_CLASSES), jnp.float32),
        in_specs=[vmem] * 5,
        out_specs=vmem,
    )(x_tm, kp["wih0"], kp["wrec"], kp["wtail"], kp["bias"])
    return out


# ------------------------ deterministic parameter init ------------------------
def init_params(key):
    ks = list(jax.random.split(key, 32))
    pop = lambda: ks.pop(0)
    scale = 0.1

    def w(shape):
        return (scale * jax.random.normal(pop(), shape)).astype(jnp.float32)

    H = HIDDEN
    p = {}
    # LSTM layer 0 (weights stored already transposed: (in, 4H))
    p["wih0"] = w((INPUT_SIZE, 4 * H))
    p["whh0"] = w((H, 4 * H))
    p["b0"] = (w((4 * H,)) + w((4 * H,)))[None, :]      # b_ih + b_hh
    # LSTM layer 1
    p["wih1"] = w((H, 4 * H))
    p["whh1"] = w((H, 4 * H))
    p["b1"] = (w((4 * H,)) + w((4 * H,)))[None, :]
    # fc: Linear(HIDDEN, 128)
    p["wfc"] = w((H, FC_OUT))
    p["bfc"] = w((FC_OUT,))[None, :]
    # Classifier MLP
    p["w1"] = w((FC_OUT, FC_OUT))
    p["bm1"] = w((FC_OUT,))[None, :]
    p["w2"] = w((FC_OUT, FC_OUT))
    p["bm2"] = w((FC_OUT,))[None, :]
    p["w3"] = w((FC_OUT, NUM_CLASSES))
    p["bm3"] = w((NUM_CLASSES,))[None, :]
    return p


def pack_kernel_params(p):
    """Host-side packing: gate pre-scaling, layer fusion, bf16 cast, slab packing."""
    H = HIDDEN
    # 0.5 pre-scale on i/f/o gate columns (half-angle sigmoid), 1.0 on the g gate.
    gs = jnp.concatenate([jnp.full((H,), 0.5), jnp.full((H,), 0.5),
                          jnp.ones((H,)), jnp.full((H,), 0.5)]).astype(jnp.float32)

    wih0 = (p["wih0"] * gs[None, :]).astype(jnp.bfloat16)          # (I, 4H)
    b0 = p["b0"] * gs[None, :]                                     # (1, 4H) f32

    # Packed recurrent weight for the wavefront step: (2H, 8H)
    #   [ whh0 | wih1 ]
    #   [   0  | whh1 ]
    whh0 = p["whh0"] * gs[None, :]
    wih1 = p["wih1"] * gs[None, :]
    whh1 = p["whh1"] * gs[None, :]
    top = jnp.concatenate([whh0, wih1], axis=1)
    bot = jnp.concatenate([jnp.zeros((H, 4 * H), jnp.float32), whh1], axis=1)
    wrec = jnp.concatenate([top, bot], axis=0).astype(jnp.bfloat16)  # (64, 256)
    b1 = p["b1"] * gs[None, :]

    # fc fused into the first classifier Linear (no nonlinearity between them).
    w_f1 = p["wfc"] @ p["w1"]                                      # (H, 128)
    b_f1 = p["bfc"] @ p["w1"] + p["bm1"]                           # (1, 128)

    w3p = jnp.zeros((FC_OUT, FC_OUT), jnp.float32).at[:, :NUM_CLASSES].set(p["w3"])
    wtail = jnp.concatenate([w_f1, p["w2"], w3p], axis=0).astype(jnp.bfloat16)  # (288,128)

    bm3p = jnp.zeros((1, FC_OUT), jnp.float32).at[:, :NUM_CLASSES].set(p["bm3"])
    bias = jnp.concatenate([b0, b1, b_f1, p["bm2"], bm3p], axis=0).astype(jnp.float32)

    return {"wih0": wih0, "wrec": wrec, "wtail": wtail, "bias": bias}


# ----------------------------- pure-JAX reference ------------------------------
def reference_forward(x, p):
    H = HIDDEN

    def cell(x_t, h, c, wihT, whhT, b):
        gates = x_t @ wihT + h @ whhT + b
        i_g = jax.nn.sigmoid(gates[:, 0 * H:1 * H])
        f_g = jax.nn.sigmoid(gates[:, 1 * H:2 * H])
        g_g = jnp.tanh(gates[:, 2 * H:3 * H])
        o_g = jax.nn.sigmoid(gates[:, 3 * H:4 * H])
        c_new = f_g * c + i_g * g_g
        return o_g * jnp.tanh(c_new), c_new

    b_sz = x.shape[0]
    zeros = jnp.zeros((b_sz, H), jnp.float32)
    h0 = c0 = h1 = c1 = zeros
    for t in range(x.shape[1]):
        x_t = x[:, t, :]
        h0, c0 = cell(x_t, h0, c0, p["wih0"], p["whh0"], p["b0"])
        h1, c1 = cell(h0, h1, c1, p["wih1"], p["whh1"], p["b1"])

    y = h1 @ p["wfc"] + p["bfc"]
    z = jnp.maximum(y @ p["w1"] + p["bm1"], 0.0)
    z = jnp.maximum(z @ p["w2"] + p["bm2"], 0.0)
    z = jnp.maximum(z @ p["w3"] + p["bm3"], 0.0)
    return jax.nn.softmax(z, axis=1)


# ----------------------------------- main --------------------------------------
if __name__ == "__main__":
    key = jax.random.PRNGKey(0)
    kx, kparams = jax.random.split(key)
    x = jax.random.normal(kx, (B, T, INPUT_SIZE), dtype=jnp.float32)
    params = init_params(kparams)
    kernel_params = pack_kernel_params(params)

    out = inception_time_monitor_lstm(x, kernel_params)
    out = jax.block_until_ready(out)

    ref = reference_forward(x, params)
    assert out.shape == (B, NUM_CLASSES)
    assert jnp.all(jnp.isfinite(out))
    # rows of a softmax sum to 1 (exact normalization in-kernel)
    assert jnp.allclose(jnp.sum(out, axis=1), 1.0, atol=1e-3)
    # bf16 matmul operands (f32 accumulation) vs. f32 reference
    assert jnp.allclose(out, ref, rtol=2e-2, atol=5e-3), "mismatch vs pure-JAX reference"

    print("KERNEL_OK")
</pallas_src>

<mosaic_0001>
module attributes {stable_mosaic.version = 11 : i64} {
  func.func @lstm_mlp_kernel(%arg0: memref<64x16xf32, #tpu.memory_space<vmem>>, %arg1: memref<16x128xbf16, #tpu.memory_space<vmem>>, %arg2: memref<64x256xbf16, #tpu.memory_space<vmem>>, %arg3: memref<288x128xbf16, #tpu.memory_space<vmem>>, %arg4: memref<5x128xf32, #tpu.memory_space<vmem>>, %arg5: memref<8x23xf32, #tpu.memory_space<vmem>>) attributes {dimension_semantics = [], scalar_prefetch = 0 : i64, scratch_operands = 0 : i64, tpu.core_type = #tpu.core_type<tc>} {
    %c0 = arith.constant 0 : index
    %c0_0 = arith.constant 0 : index
    %0 = vector.load %arg4[%c0, %c0_0] : memref<5x128xf32, #tpu.memory_space<vmem>>, vector<5x128xf32>
    %1 = vector.extract_strided_slice %0 {offsets = [0, 0], sizes = [1, 128], strides = [1, 1]} : vector<5x128xf32> to vector<1x128xf32>
    %2 = vector.extract_strided_slice %0 {offsets = [1, 0], sizes = [1, 128], strides = [1, 1]} : vector<5x128xf32> to vector<1x128xf32>
    %3 = vector.extract_strided_slice %0 {offsets = [2, 0], sizes = [1, 128], strides = [1, 1]} : vector<5x128xf32> to vector<1x128xf32>
    %4 = vector.extract_strided_slice %0 {offsets = [3, 0], sizes = [1, 128], strides = [1, 1]} : vector<5x128xf32> to vector<1x128xf32>
    %5 = vector.extract_strided_slice %0 {offsets = [4, 0], sizes = [1, 23], strides = [1, 1]} : vector<5x128xf32> to vector<1x23xf32>
    %c0_1 = arith.constant 0 : index
    %c0_2 = arith.constant 0 : index
    %6 = vector.load %arg0[%c0_1, %c0_2] : memref<64x16xf32, #tpu.memory_space<vmem>>, vector<64x16xf32>
    %7 = arith.truncf %6 : vector<64x16xf32> to vector<64x16xbf16>
    %c0_3 = arith.constant 0 : index
    %c0_4 = arith.constant 0 : index
    %8 = vector.load %arg1[%c0_3, %c0_4] : memref<16x128xbf16, #tpu.memory_space<vmem>>, vector<16x128xbf16>
    %cst = arith.constant dense<0.000000e+00> : vector<64x128xf32>
    %9 = tpu.matmul %7, %8, %cst {dimension_numbers = #tpu.dot_dimension_numbers<[1], [0], [0], [1], [0, 0, 1, 1], [], []>} : vector<64x16xbf16>, vector<16x128xbf16>, vector<64x128xf32> -> vector<64x128xf32>
    %10 = vector.broadcast %1 : vector<1x128xf32> to vector<64x128xf32>
    %11 = arith.addf %9, %10 : vector<64x128xf32>
    %12 = vector.shape_cast %11 : vector<64x128xf32> to vector<8x8x128xf32>
    %c0_5 = arith.constant 0 : index
    %c0_6 = arith.constant 0 : index
    %13 = vector.load %arg2[%c0_5, %c0_6] : memref<64x256xbf16, #tpu.memory_space<vmem>>, vector<64x256xbf16>
    %14 = tpu.iota {dimensions = array<i32: 1>} : vector<8x128xi32>
    %c64_i32 = arith.constant 64 : i32
    %15 = vector.broadcast %c64_i32 : i32 to vector<8x128xi32>
    %16 = arith.cmpi sge, %14, %15 : vector<8x128xi32>
    %c96_i32 = arith.constant 96 : i32
    %17 = vector.broadcast %c96_i32 : i32 to vector<8x128xi32>
    %18 = arith.cmpi slt, %14, %17 : vector<8x128xi32>
    %19 = arith.andi %16, %18 : vector<8x128xi1>
    %cst_7 = arith.constant 1.000000e+00 : f32
    %cst_8 = arith.constant 5.000000e-01 : f32
    %20 = vector.broadcast %cst_7 : f32 to vector<8x128xf32>
    %21 = vector.broadcast %cst_8 : f32 to vector<8x128xf32>
    %22 = arith.select %19, %20, %21 : vector<8x128xi1>, vector<8x128xf32>
    %cst_9 = arith.constant 0.000000e+00 : f32
    %cst_10 = arith.constant 5.000000e-01 : f32
    %23 = vector.broadcast %cst_9 : f32 to vector<8x128xf32>
    %24 = vector.broadcast %cst_10 : f32 to vector<8x128xf32>
    %25 = arith.select %19, %23, %24 : vector<8x128xi1>, vector<8x128xf32>
    %26 = vector.shape_cast %2 : vector<1x128xf32> to vector<1x128xf32>
    %27 = vector.broadcast %26 : vector<1x128xf32> to vector<8x128xf32>
    %cst_11 = arith.constant 0.000000e+00 : f32
    %28 = vector.broadcast %cst_11 : f32 to vector<8x32xf32>
    %29 = vector.extract_strided_slice %12 {offsets = [0, 0, 0], sizes = [1, 8, 128], strides = [1, 1, 1]} : vector<8x8x128xf32> to vector<1x8x128xf32>
    %30 = vector.shape_cast %29 : vector<1x8x128xf32> to vector<8x128xf32>
    %31 = math.tanh %30 : vector<8x128xf32>
    %32 = arith.mulf %31, %22 : vector<8x128xf32>
    %33 = arith.addf %32, %25 : vector<8x128xf32>
    %34 = vector.extract_strided_slice %33 {offsets = [0, 0], sizes = [8, 32], strides = [1, 1]} : vector<8x128xf32> to vector<8x32xf32>
    %35 = vector.extract_strided_slice %33 {offsets = [0, 32], sizes = [8, 32], strides = [1, 1]} : vector<8x128xf32> to vector<8x32xf32>
    %36 = vector.extract_strided_slice %33 {offsets = [0, 64], sizes = [8, 32], strides = [1, 1]} : vector<8x128xf32> to vector<8x32xf32>
    %37 = vector.extract_strided_slice %33 {offsets = [0, 96], sizes = [8, 32], strides = [1, 1]} : vector<8x128xf32> to vector<8x32xf32>
    %38 = arith.mulf %35, %28 : vector<8x32xf32>
    %39 = arith.mulf %34, %36 : vector<8x32xf32>
    %40 = arith.addf %38, %39 : vector<8x32xf32>
    %41 = math.tanh %40 : vector<8x32xf32>
    %42 = arith.mulf %37, %41 : vector<8x32xf32>
    %43 = tpu.concatenate %42, %28 in 1 : vector<8x32xf32>, vector<8x32xf32> -> vector<8x64xf32>
    %44 = arith.truncf %43 : vector<8x64xf32> to vector<8x64xbf16>
    %cst_12 = arith.constant dense<0.000000e+00> : vector<8x256xf32>
    %45 = tpu.matmul %44, %13, %cst_12 {dimension_numbers = #tpu.dot_dimension_numbers<[1], [0], [0], [1], [0, 0, 1, 1], [], []>} : vector<8x64xbf16>, vector<64x256xbf16>, vector<8x256xf32> -> vector<8x256xf32>
    %46 = vector.extract_strided_slice %12 {offsets = [1, 0, 0], sizes = [1, 8, 128], strides = [1, 1, 1]} : vector<8x8x128xf32> to vector<1x8x128xf32>
    %47 = vector.shape_cast %46 : vector<1x8x128xf32> to vector<8x128xf32>
    %48 = vector.extract_strided_slice %45 {offsets = [0, 0], sizes = [8, 128], strides = [1, 1]} : vector<8x256xf32> to vector<8x128xf32>
    %49 = arith.addf %47, %48 : vector<8x128xf32>
    %50 = math.tanh %49 : vector<8x128xf32>
    %51 = arith.mulf %50, %22 : vector<8x128xf32>
    %52 = arith.addf %51, %25 : vector<8x128xf32>
    %53 = vector.extract_strided_slice %52 {offsets = [0, 0], sizes = [8, 32], strides = [1, 1]} : vector<8x128xf32> to vector<8x32xf32>
    %54 = vector.extract_strided_slice %52 {offsets = [0, 32], sizes = [8, 32], strides = [1, 1]} : vector<8x128xf32> to vector<8x32xf32>
    %55 = vector.extract_strided_slice %52 {offsets = [0, 64], sizes = [8, 32], strides = [1, 1]} : vector<8x128xf32> to vector<8x32xf32>
    %56 = vector.extract_strided_slice %52 {offsets = [0, 96], sizes = [8, 32], strides = [1, 1]} : vector<8x128xf32> to vector<8x32xf32>
    %57 = arith.mulf %54, %40 : vector<8x32xf32>
    %58 = arith.mulf %53, %55 : vector<8x32xf32>
    %59 = arith.addf %57, %58 : vector<8x32xf32>
    %60 = math.tanh %59 : vector<8x32xf32>
    %61 = arith.mulf %56, %60 : vector<8x32xf32>
    %62 = vector.extract_strided_slice %45 {offsets = [0, 128], sizes = [8, 128], strides = [1, 1]} : vector<8x256xf32> to vector<8x128xf32>
    %63 = arith.addf %62, %27 : vector<8x128xf32>
    %64 = math.tanh %63 : vector<8x128xf32>
    %65 = arith.mulf %64, %22 : vector<8x128xf32>
    %66 = arith.addf %65, %25 : vector<8x128xf32>
    %67 = vector.extract_strided_slice %66 {offsets = [0, 0], sizes = [8, 32], strides = [1, 1]} : vector<8x128xf32> to vector<8x32xf32>
    %68 = vector.extract_strided_slice %66 {offsets = [0, 32], sizes = [8, 32], strides = [1, 1]} : vector<8x128xf32> to vector<8x32xf32>
    %69 = vector.extract_strided_slice %66 {offsets = [0, 64], sizes = [8, 32], strides = [1, 1]} : vector<8x128xf32> to vector<8x32xf32>
    %70 = vector.extract_strided_slice %66 {offsets = [0, 96], sizes = [8, 32], strides = [1, 1]} : vector<8x128xf32> to vector<8x32xf32>
    %71 = arith.mulf %68, %28 : vector<8x32xf32>
    %72 = arith.mulf %67, %69 : vector<8x32xf32>
    %73 = arith.addf %71, %72 : vector<8x32xf32>
    %74 = math.tanh %73 : vector<8x32xf32>
    %75 = arith.mulf %70, %74 : vector<8x32xf32>
    %76 = tpu.concatenate %61, %75 in 1 : vector<8x32xf32>, vector<8x32xf32> -> vector<8x64xf32>
    %77 = arith.truncf %76 : vector<8x64xf32> to vector<8x64xbf16>
    %cst_13 = arith.constant dense<0.000000e+00> : vector<8x256xf32>
    %78 = tpu.matmul %77, %13, %cst_13 {dimension_numbers = #tpu.dot_dimension_numbers<[1], [0], [0], [1], [0, 0, 1, 1], [], []>} : vector<8x64xbf16>, vector<64x256xbf16>, vector<8x256xf32> -> vector<8x256xf32>
    %79 = vector.extract_strided_slice %12 {offsets = [2, 0, 0], sizes = [1, 8, 128], strides = [1, 1, 1]} : vector<8x8x128xf32> to vector<1x8x128xf32>
    %80 = vector.shape_cast %79 : vector<1x8x128xf32> to vector<8x128xf32>
    %81 = vector.extract_strided_slice %78 {offsets = [0, 0], sizes = [8, 128], strides = [1, 1]} : vector<8x256xf32> to vector<8x128xf32>
    %82 = arith.addf %80, %81 : vector<8x128xf32>
    %83 = math.tanh %82 : vector<8x128xf32>
    %84 = arith.mulf %83, %22 : vector<8x128xf32>
    %85 = arith.addf %84, %25 : vector<8x128xf32>
    %86 = vector.extract_strided_slice %85 {offsets = [0, 0], sizes = [8, 32], strides = [1, 1]} : vector<8x128xf32> to vector<8x32xf32>
    %87 = vector.extract_strided_slice %85 {offsets = [0, 32], sizes = [8, 32], strides = [1, 1]} : vector<8x128xf32> to vector<8x32xf32>
    %88 = vector.extract_strided_slice %85 {offsets = [0, 64], sizes = [8, 32], strides = [1, 1]} : vector<8x128xf32> to vector<8x32xf32>
    %89 = vector.extract_strided_slice %85 {offsets = [0, 96], sizes = [8, 32], strides = [1, 1]} : vector<8x128xf32> to vector<8x32xf32>
    %90 = arith.mulf %87, %59 : vector<8x32xf32>
    %91 = arith.mulf %86, %88 : vector<8x32xf32>
    %92 = arith.addf %90, %91 : vector<8x32xf32>
    %93 = math.tanh %92 : vector<8x32xf32>
    %94 = arith.mulf %89, %93 : vector<8x32xf32>
    %95 = vector.extract_strided_slice %78 {offsets = [0, 128], sizes = [8, 128], strides = [1, 1]} : vector<8x256xf32> to vector<8x128xf32>
    %96 = arith.addf %95, %27 : vector<8x128xf32>
    %97 = math.tanh %96 : vector<8x128xf32>
    %98 = arith.mulf %97, %22 : vector<8x128xf32>
    %99 = arith.addf %98, %25 : vector<8x128xf32>
    %100 = vector.extract_strided_slice %99 {offsets = [0, 0], sizes = [8, 32], strides = [1, 1]} : vector<8x128xf32> to vector<8x32xf32>
    %101 = vector.extract_strided_slice %99 {offsets = [0, 32], sizes = [8, 32], strides = [1, 1]} : vector<8x128xf32> to vector<8x32xf32>
    %102 = vector.extract_strided_slice %99 {offsets = [0, 64], sizes = [8, 32], strides = [1, 1]} : vector<8x128xf32> to vector<8x32xf32>
    %103 = vector.extract_strided_slice %99 {offsets = [0, 96], sizes = [8, 32], strides = [1, 1]} : vector<8x128xf32> to vector<8x32xf32>
    %104 = arith.mulf %101, %73 : vector<8x32xf32>
    %105 = arith.mulf %100, %102 : vector<8x32xf32>
    %106 = arith.addf %104, %105 : vector<8x32xf32>
    %107 = math.tanh %106 : vector<8x32xf32>
    %108 = arith.mulf %103, %107 : vector<8x32xf32>
    %109 = tpu.concatenate %94, %108 in 1 : vector<8x32xf32>, vector<8x32xf32> -> vector<8x64xf32>
    %110 = arith.truncf %109 : vector<8x64xf32> to vector<8x64xbf16>
    %cst_14 = arith.constant dense<0.000000e+00> : vector<8x256xf32>
    %111 = tpu.matmul %110, %13, %cst_14 {dimension_numbers = #tpu.dot_dimension_numbers<[1], [0], [0], [1], [0, 0, 1, 1], [], []>} : vector<8x64xbf16>, vector<64x256xbf16>, vector<8x256xf32> -> vector<8x256xf32>
    %112 = vector.extract_strided_slice %12 {offsets = [3, 0, 0], sizes = [1, 8, 128], strides = [1, 1, 1]} : vector<8x8x128xf32> to vector<1x8x128xf32>
    %113 = vector.shape_cast %112 : vector<1x8x128xf32> to vector<8x128xf32>
    %114 = vector.extract_strided_slice %111 {offsets = [0, 0], sizes = [8, 128], strides = [1, 1]} : vector<8x256xf32> to vector<8x128xf32>
    %115 = arith.addf %113, %114 : vector<8x128xf32>
    %116 = math.tanh %115 : vector<8x128xf32>
    %117 = arith.mulf %116, %22 : vector<8x128xf32>
    %118 = arith.addf %117, %25 : vector<8x128xf32>
    %119 = vector.extract_strided_slice %118 {offsets = [0, 0], sizes = [8, 32], strides = [1, 1]} : vector<8x128xf32> to vector<8x32xf32>
    %120 = vector.extract_strided_slice %118 {offsets = [0, 32], sizes = [8, 32], strides = [1, 1]} : vector<8x128xf32> to vector<8x32xf32>
    %121 = vector.extract_strided_slice %118 {offsets = [0, 64], sizes = [8, 32], strides = [1, 1]} : vector<8x128xf32> to vector<8x32xf32>
    %122 = vector.extract_strided_slice %118 {offsets = [0, 96], sizes = [8, 32], strides = [1, 1]} : vector<8x128xf32> to vector<8x32xf32>
    %123 = arith.mulf %120, %92 : vector<8x32xf32>
    %124 = arith.mulf %119, %121 : vector<8x32xf32>
    %125 = arith.addf %123, %124 : vector<8x32xf32>
    %126 = math.tanh %125 : vector<8x32xf32>
    %127 = arith.mulf %122, %126 : vector<8x32xf32>
    %128 = vector.extract_strided_slice %111 {offsets = [0, 128], sizes = [8, 128], strides = [1, 1]} : vector<8x256xf32> to vector<8x128xf32>
    %129 = arith.addf %128, %27 : vector<8x128xf32>
    %130 = math.tanh %129 : vector<8x128xf32>
    %131 = arith.mulf %130, %22 : vector<8x128xf32>
    %132 = arith.addf %131, %25 : vector<8x128xf32>
    %133 = vector.extract_strided_slice %132 {offsets = [0, 0], sizes = [8, 32], strides = [1, 1]} : vector<8x128xf32> to vector<8x32xf32>
    %134 = vector.extract_strided_slice %132 {offsets = [0, 32], sizes = [8, 32], strides = [1, 1]} : vector<8x128xf32> to vector<8x32xf32>
    %135 = vector.extract_strided_slice %132 {offsets = [0, 64], sizes = [8, 32], strides = [1, 1]} : vector<8x128xf32> to vector<8x32xf32>
    %136 = vector.extract_strided_slice %132 {offsets = [0, 96], sizes = [8, 32], strides = [1, 1]} : vector<8x128xf32> to vector<8x32xf32>
    %137 = arith.mulf %134, %106 : vector<8x32xf32>
    %138 = arith.mulf %133, %135 : vector<8x32xf32>
    %139 = arith.addf %137, %138 : vector<8x32xf32>
    %140 = math.tanh %139 : vector<8x32xf32>
    %141 = arith.mulf %136, %140 : vector<8x32xf32>
    %142 = tpu.concatenate %127, %141 in 1 : vector<8x32xf32>, vector<8x32xf32> -> vector<8x64xf32>
    %143 = arith.truncf %142 : vector<8x64xf32> to vector<8x64xbf16>
    %cst_15 = arith.constant dense<0.000000e+00> : vector<8x256xf32>
    %144 = tpu.matmul %143, %13, %cst_15 {dimension_numbers = #tpu.dot_dimension_numbers<[1], [0], [0], [1], [0, 0, 1, 1], [], []>} : vector<8x64xbf16>, vector<64x256xbf16>, vector<8x256xf32> -> vector<8x256xf32>
    %145 = vector.extract_strided_slice %12 {offsets = [4, 0, 0], sizes = [1, 8, 128], strides = [1, 1, 1]} : vector<8x8x128xf32> to vector<1x8x128xf32>
    %146 = vector.shape_cast %145 : vector<1x8x128xf32> to vector<8x128xf32>
    %147 = vector.extract_strided_slice %144 {offsets = [0, 0], sizes = [8, 128], strides = [1, 1]} : vector<8x256xf32> to vector<8x128xf32>
    %148 = arith.addf %146, %147 : vector<8x128xf32>
    %149 = math.tanh %148 : vector<8x128xf32>
    %150 = arith.mulf %149, %22 : vector<8x128xf32>
    %151 = arith.addf %150, %25 : vector<8x128xf32>
    %152 = vector.extract_strided_slice %151 {offsets = [0, 0], sizes = [8, 32], strides = [1, 1]} : vector<8x128xf32> to vector<8x32xf32>
    %153 = vector.extract_strided_slice %151 {offsets = [0, 32], sizes = [8, 32], strides = [1, 1]} : vector<8x128xf32> to vector<8x32xf32>
    %154 = vector.extract_strided_slice %151 {offsets = [0, 64], sizes = [8, 32], strides = [1, 1]} : vector<8x128xf32> to vector<8x32xf32>
    %155 = vector.extract_strided_slice %151 {offsets = [0, 96], sizes = [8, 32], strides = [1, 1]} : vector<8x128xf32> to vector<8x32xf32>
    %156 = arith.mulf %153, %125 : vector<8x32xf32>
    %157 = arith.mulf %152, %154 : vector<8x32xf32>
    %158 = arith.addf %156, %157 : vector<8x32xf32>
    %159 = math.tanh %158 : vector<8x32xf32>
    %160 = arith.mulf %155, %159 : vector<8x32xf32>
    %161 = vector.extract_strided_slice %144 {offsets = [0, 128], sizes = [8, 128], strides = [1, 1]} : vector<8x256xf32> to vector<8x128xf32>
    %162 = arith.addf %161, %27 : vector<8x128xf32>
    %163 = math.tanh %162 : vector<8x128xf32>
    %164 = arith.mulf %163, %22 : vector<8x128xf32>
    %165 = arith.addf %164, %25 : vector<8x128xf32>
    %166 = vector.extract_strided_slice %165 {offsets = [0, 0], sizes = [8, 32], strides = [1, 1]} : vector<8x128xf32> to vector<8x32xf32>
    %167 = vector.extract_strided_slice %165 {offsets = [0, 32], sizes = [8, 32], strides = [1, 1]} : vector<8x128xf32> to vector<8x32xf32>
    %168 = vector.extract_strided_slice %165 {offsets = [0, 64], sizes = [8, 32], strides = [1, 1]} : vector<8x128xf32> to vector<8x32xf32>
    %169 = vector.extract_strided_slice %165 {offsets = [0, 96], sizes = [8, 32], strides = [1, 1]} : vector<8x128xf32> to vector<8x32xf32>
    %170 = arith.mulf %167, %139 : vector<8x32xf32>
    %171 = arith.mulf %166, %168 : vector<8x32xf32>
    %172 = arith.addf %170, %171 : vector<8x32xf32>
    %173 = math.tanh %172 : vector<8x32xf32>
    %174 = arith.mulf %169, %173 : vector<8x32xf32>
    %175 = tpu.concatenate %160, %174 in 1 : vector<8x32xf32>, vector<8x32xf32> -> vector<8x64xf32>
    %176 = arith.truncf %175 : vector<8x64xf32> to vector<8x64xbf16>
    %cst_16 = arith.constant dense<0.000000e+00> : vector<8x256xf32>
    %177 = tpu.matmul %176, %13, %cst_16 {dimension_numbers = #tpu.dot_dimension_numbers<[1], [0], [0], [1], [0, 0, 1, 1], [], []>} : vector<8x64xbf16>, vector<64x256xbf16>, vector<8x256xf32> -> vector<8x256xf32>
    %178 = vector.extract_strided_slice %12 {offsets = [5, 0, 0], sizes = [1, 8, 128], strides = [1, 1, 1]} : vector<8x8x128xf32> to vector<1x8x128xf32>
    %179 = vector.shape_cast %178 : vector<1x8x128xf32> to vector<8x128xf32>
    %180 = vector.extract_strided_slice %177 {offsets = [0, 0], sizes = [8, 128], strides = [1, 1]} : vector<8x256xf32> to vector<8x128xf32>
    %181 = arith.addf %179, %180 : vector<8x128xf32>
    %182 = math.tanh %181 : vector<8x128xf32>
    %183 = arith.mulf %182, %22 : vector<8x128xf32>
    %184 = arith.addf %183, %25 : vector<8x128xf32>
    %185 = vector.extract_strided_slice %184 {offsets = [0, 0], sizes = [8, 32], strides = [1, 1]} : vector<8x128xf32> to vector<8x32xf32>
    %186 = vector.extract_strided_slice %184 {offsets = [0, 32], sizes = [8, 32], strides = [1, 1]} : vector<8x128xf32> to vector<8x32xf32>
    %187 = vector.extract_strided_slice %184 {offsets = [0, 64], sizes = [8, 32], strides = [1, 1]} : vector<8x128xf32> to vector<8x32xf32>
    %188 = vector.extract_strided_slice %184 {offsets = [0, 96], sizes = [8, 32], strides = [1, 1]} : vector<8x128xf32> to vector<8x32xf32>
    %189 = arith.mulf %186, %158 : vector<8x32xf32>
    %190 = arith.mulf %185, %187 : vector<8x32xf32>
    %191 = arith.addf %189, %190 : vector<8x32xf32>
    %192 = math.tanh %191 : vector<8x32xf32>
    %193 = arith.mulf %188, %192 : vector<8x32xf32>
    %194 = vector.extract_strided_slice %177 {offsets = [0, 128], sizes = [8, 128], strides = [1, 1]} : vector<8x256xf32> to vector<8x128xf32>
    %195 = arith.addf %194, %27 : vector<8x128xf32>
    %196 = math.tanh %195 : vector<8x128xf32>
    %197 = arith.mulf %196, %22 : vector<8x128xf32>
    %198 = arith.addf %197, %25 : vector<8x128xf32>
    %199 = vector.extract_strided_slice %198 {offsets = [0, 0], sizes = [8, 32], strides = [1, 1]} : vector<8x128xf32> to vector<8x32xf32>
    %200 = vector.extract_strided_slice %198 {offsets = [0, 32], sizes = [8, 32], strides = [1, 1]} : vector<8x128xf32> to vector<8x32xf32>
    %201 = vector.extract_strided_slice %198 {offsets = [0, 64], sizes = [8, 32], strides = [1, 1]} : vector<8x128xf32> to vector<8x32xf32>
    %202 = vector.extract_strided_slice %198 {offsets = [0, 96], sizes = [8, 32], strides = [1, 1]} : vector<8x128xf32> to vector<8x32xf32>
    %203 = arith.mulf %200, %172 : vector<8x32xf32>
    %204 = arith.mulf %199, %201 : vector<8x32xf32>
    %205 = arith.addf %203, %204 : vector<8x32xf32>
    %206 = math.tanh %205 : vector<8x32xf32>
    %207 = arith.mulf %202, %206 : vector<8x32xf32>
    %208 = tpu.concatenate %193, %207 in 1 : vector<8x32xf32>, vector<8x32xf32> -> vector<8x64xf32>
    %209 = arith.truncf %208 : vector<8x64xf32> to vector<8x64xbf16>
    %cst_17 = arith.constant dense<0.000000e+00> : vector<8x256xf32>
    %210 = tpu.matmul %209, %13, %cst_17 {dimension_numbers = #tpu.dot_dimension_numbers<[1], [0], [0], [1], [0, 0, 1, 1], [], []>} : vector<8x64xbf16>, vector<64x256xbf16>, vector<8x256xf32> -> vector<8x256xf32>
    %211 = vector.extract_strided_slice %12 {offsets = [6, 0, 0], sizes = [1, 8, 128], strides = [1, 1, 1]} : vector<8x8x128xf32> to vector<1x8x128xf32>
    %212 = vector.shape_cast %211 : vector<1x8x128xf32> to vector<8x128xf32>
    %213 = vector.extract_strided_slice %210 {offsets = [0, 0], sizes = [8, 128], strides = [1, 1]} : vector<8x256xf32> to vector<8x128xf32>
    %214 = arith.addf %212, %213 : vector<8x128xf32>
    %215 = math.tanh %214 : vector<8x128xf32>
    %216 = arith.mulf %215, %22 : vector<8x128xf32>
    %217 = arith.addf %216, %25 : vector<8x128xf32>
    %218 = vector.extract_strided_slice %217 {offsets = [0, 0], sizes = [8, 32], strides = [1, 1]} : vector<8x128xf32> to vector<8x32xf32>
    %219 = vector.extract_strided_slice %217 {offsets = [0, 32], sizes = [8, 32], strides = [1, 1]} : vector<8x128xf32> to vector<8x32xf32>
    %220 = vector.extract_strided_slice %217 {offsets = [0, 64], sizes = [8, 32], strides = [1, 1]} : vector<8x128xf32> to vector<8x32xf32>
    %221 = vector.extract_strided_slice %217 {offsets = [0, 96], sizes = [8, 32], strides = [1, 1]} : vector<8x128xf32> to vector<8x32xf32>
    %222 = arith.mulf %219, %191 : vector<8x32xf32>
    %223 = arith.mulf %218, %220 : vector<8x32xf32>
    %224 = arith.addf %222, %223 : vector<8x32xf32>
    %225 = math.tanh %224 : vector<8x32xf32>
    %226 = arith.mulf %221, %225 : vector<8x32xf32>
    %227 = vector.extract_strided_slice %210 {offsets = [0, 128], sizes = [8, 128], strides = [1, 1]} : vector<8x256xf32> to vector<8x128xf32>
    %228 = arith.addf %227, %27 : vector<8x128xf32>
    %229 = math.tanh %228 : vector<8x128xf32>
    %230 = arith.mulf %229, %22 : vector<8x128xf32>
    %231 = arith.addf %230, %25 : vector<8x128xf32>
    %232 = vector.extract_strided_slice %231 {offsets = [0, 0], sizes = [8, 32], strides = [1, 1]} : vector<8x128xf32> to vector<8x32xf32>
    %233 = vector.extract_strided_slice %231 {offsets = [0, 32], sizes = [8, 32], strides = [1, 1]} : vector<8x128xf32> to vector<8x32xf32>
    %234 = vector.extract_strided_slice %231 {offsets = [0, 64], sizes = [8, 32], strides = [1, 1]} : vector<8x128xf32> to vector<8x32xf32>
    %235 = vector.extract_strided_slice %231 {offsets = [0, 96], sizes = [8, 32], strides = [1, 1]} : vector<8x128xf32> to vector<8x32xf32>
    %236 = arith.mulf %233, %205 : vector<8x32xf32>
    %237 = arith.mulf %232, %234 : vector<8x32xf32>
    %238 = arith.addf %236, %237 : vector<8x32xf32>
    %239 = math.tanh %238 : vector<8x32xf32>
    %240 = arith.mulf %235, %239 : vector<8x32xf32>
    %241 = tpu.concatenate %226, %240 in 1 : vector<8x32xf32>, vector<8x32xf32> -> vector<8x64xf32>
    %242 = arith.truncf %241 : vector<8x64xf32> to vector<8x64xbf16>
    %cst_18 = arith.constant dense<0.000000e+00> : vector<8x256xf32>
    %243 = tpu.matmul %242, %13, %cst_18 {dimension_numbers = #tpu.dot_dimension_numbers<[1], [0], [0], [1], [0, 0, 1, 1], [], []>} : vector<8x64xbf16>, vector<64x256xbf16>, vector<8x256xf32> -> vector<8x256xf32>
    %244 = vector.extract_strided_slice %12 {offsets = [7, 0, 0], sizes = [1, 8, 128], strides = [1, 1, 1]} : vector<8x8x128xf32> to vector<1x8x128xf32>
    %245 = vector.shape_cast %244 : vector<1x8x128xf32> to vector<8x128xf32>
    %246 = vector.extract_strided_slice %243 {offsets = [0, 0], sizes = [8, 128], strides = [1, 1]} : vector<8x256xf32> to vector<8x128xf32>
    %247 = arith.addf %245, %246 : vector<8x128xf32>
    %248 = math.tanh %247 : vector<8x128xf32>
    %249 = arith.mulf %248, %22 : vector<8x128xf32>
    %250 = arith.addf %249, %25 : vector<8x128xf32>
    %251 = vector.extract_strided_slice %250 {offsets = [0, 0], sizes = [8, 32], strides = [1, 1]} : vector<8x128xf32> to vector<8x32xf32>
    %252 = vector.extract_strided_slice %250 {offsets = [0, 32], sizes = [8, 32], strides = [1, 1]} : vector<8x128xf32> to vector<8x32xf32>
    %253 = vector.extract_strided_slice %250 {offsets = [0, 64], sizes = [8, 32], strides = [1, 1]} : vector<8x128xf32> to vector<8x32xf32>
    %254 = vector.extract_strided_slice %250 {offsets = [0, 96], sizes = [8, 32], strides = [1, 1]} : vector<8x128xf32> to vector<8x32xf32>
    %255 = arith.mulf %252, %224 : vector<8x32xf32>
    %256 = arith.mulf %251, %253 : vector<8x32xf32>
    %257 = arith.addf %255, %256 : vector<8x32xf32>
    %258 = math.tanh %257 : vector<8x32xf32>
    %259 = arith.mulf %254, %258 : vector<8x32xf32>
    %260 = vector.extract_strided_slice %243 {offsets = [0, 128], sizes = [8, 128], strides = [1, 1]} : vector<8x256xf32> to vector<8x128xf32>
    %261 = arith.addf %260, %27 : vector<8x128xf32>
    %262 = math.tanh %261 : vector<8x128xf32>
    %263 = arith.mulf %262, %22 : vector<8x128xf32>
    %264 = arith.addf %263, %25 : vector<8x128xf32>
    %265 = vector.extract_strided_slice %264 {offsets = [0, 0], sizes = [8, 32], strides = [1, 1]} : vector<8x128xf32> to vector<8x32xf32>
    %266 = vector.extract_strided_slice %264 {offsets = [0, 32], sizes = [8, 32], strides = [1, 1]} : vector<8x128xf32> to vector<8x32xf32>
    %267 = vector.extract_strided_slice %264 {offsets = [0, 64], sizes = [8, 32], strides = [1, 1]} : vector<8x128xf32> to vector<8x32xf32>
    %268 = vector.extract_strided_slice %264 {offsets = [0, 96], sizes = [8, 32], strides = [1, 1]} : vector<8x128xf32> to vector<8x32xf32>
    %269 = arith.mulf %266, %238 : vector<8x32xf32>
    %270 = arith.mulf %265, %267 : vector<8x32xf32>
    %271 = arith.addf %269, %270 : vector<8x32xf32>
    %272 = math.tanh %271 : vector<8x32xf32>
    %273 = arith.mulf %268, %272 : vector<8x32xf32>
    %274 = tpu.concatenate %259, %273 in 1 : vector<8x32xf32>, vector<8x32xf32> -> vector<8x64xf32>
    %275 = arith.truncf %274 : vector<8x64xf32> to vector<8x64xbf16>
    %cst_19 = arith.constant dense<0.000000e+00> : vector<8x256xf32>
    %276 = tpu.matmul %275, %13, %cst_19 {dimension_numbers = #tpu.dot_dimension_numbers<[1], [0], [0], [1], [0, 0, 1, 1], [], []>} : vector<8x64xbf16>, vector<64x256xbf16>, vector<8x256xf32> -> vector<8x256xf32>
    %277 = vector.extract_strided_slice %276 {offsets = [0, 128], sizes = [8, 128], strides = [1, 1]} : vector<8x256xf32> to vector<8x128xf32>
    %278 = arith.addf %277, %27 : vector<8x128xf32>
    %279 = math.tanh %278 : vector<8x128xf32>
    %280 = arith.mulf %279, %22 : vector<8x128xf32>
    %281 = arith.addf %280, %25 : vector<8x128xf32>
    %282 = vector.extract_strided_slice %281 {offsets = [0, 0], sizes = [8, 32], strides = [1, 1]} : vector<8x128xf32> to vector<8x32xf32>
    %283 = vector.extract_strided_slice %281 {offsets = [0, 32], sizes = [8, 32], strides = [1, 1]} : vector<8x128xf32> to vector<8x32xf32>
    %284 = vector.extract_strided_slice %281 {offsets = [0, 64], sizes = [8, 32], strides = [1, 1]} : vector<8x128xf32> to vector<8x32xf32>
    %285 = vector.extract_strided_slice %281 {offsets = [0, 96], sizes = [8, 32], strides = [1, 1]} : vector<8x128xf32> to vector<8x32xf32>
    %286 = arith.mulf %283, %271 : vector<8x32xf32>
    %287 = arith.mulf %282, %284 : vector<8x32xf32>
    %288 = arith.addf %286, %287 : vector<8x32xf32>
    %289 = math.tanh %288 : vector<8x32xf32>
    %290 = arith.mulf %285, %289 : vector<8x32xf32>
    %c0_20 = arith.constant 0 : index
    %c0_21 = arith.constant 0 : index
    %291 = vector.load %arg3[%c0_20, %c0_21] : memref<288x128xbf16, #tpu.memory_space<vmem>>, vector<32x128xbf16>
    %c32 = arith.constant 32 : index
    %c0_22 = arith.constant 0 : index
    %292 = vector.load %arg3[%c32, %c0_22] : memref<288x128xbf16, #tpu.memory_space<vmem>>, vector<128x128xbf16>
    %c160 = arith.constant 160 : index
    %c0_23 = arith.constant 0 : index
    %293 = vector.load %arg3[%c160, %c0_23] : memref<288x128xbf16, #tpu.memory_space<vmem>>, vector<128x128xbf16>
    %294 = arith.truncf %290 : vector<8x32xf32> to vector<8x32xbf16>
    %cst_24 = arith.constant dense<0.000000e+00> : vector<8x128xf32>
    %295 = tpu.matmul %294, %291, %cst_24 {dimension_numbers = #tpu.dot_dimension_numbers<[1], [0], [0], [1], [0, 0, 1, 1], [], []>} : vector<8x32xbf16>, vector<32x128xbf16>, vector<8x128xf32> -> vector<8x128xf32>
    %296 = vector.broadcast %3 : vector<1x128xf32> to vector<8x128xf32>
    %297 = arith.addf %295, %296 : vector<8x128xf32>
    %cst_25 = arith.constant 0.000000e+00 : f32
    %298 = vector.broadcast %cst_25 : f32 to vector<8x128xf32>
    %299 = arith.maximumf %297, %298 : vector<8x128xf32>
    %300 = arith.truncf %299 : vector<8x128xf32> to vector<8x128xbf16>
    %cst_26 = arith.constant dense<0.000000e+00> : vector<8x128xf32>
    %301 = tpu.matmul %300, %292, %cst_26 {dimension_numbers = #tpu.dot_dimension_numbers<[1], [0], [0], [1], [0, 0, 1, 1], [], []>} : vector<8x128xbf16>, vector<128x128xbf16>, vector<8x128xf32> -> vector<8x128xf32>
    %302 = vector.broadcast %4 : vector<1x128xf32> to vector<8x128xf32>
    %303 = arith.addf %301, %302 : vector<8x128xf32>
    %cst_27 = arith.constant 0.000000e+00 : f32
    %304 = vector.broadcast %cst_27 : f32 to vector<8x128xf32>
    %305 = arith.maximumf %303, %304 : vector<8x128xf32>
    %306 = arith.truncf %305 : vector<8x128xf32> to vector<8x128xbf16>
    %cst_28 = arith.constant dense<0.000000e+00> : vector<8x128xf32>
    %307 = tpu.matmul %306, %293, %cst_28 {dimension_numbers = #tpu.dot_dimension_numbers<[1], [0], [0], [1], [0, 0, 1, 1], [], []>} : vector<8x128xbf16>, vector<128x128xbf16>, vector<8x128xf32> -> vector<8x128xf32>
    %308 = vector.extract_strided_slice %307 {offsets = [0, 0], sizes = [8, 23], strides = [1, 1]} : vector<8x128xf32> to vector<8x23xf32>
    %309 = vector.broadcast %5 : vector<1x23xf32> to vector<8x23xf32>
    %310 = arith.addf %308, %309 : vector<8x23xf32>
    %cst_29 = arith.constant 0.000000e+00 : f32
    %311 = vector.broadcast %cst_29 : f32 to vector<8x23xf32>
    %312 = arith.maximumf %310, %311 : vector<8x23xf32>
    %cst_30 = arith.constant dense<0xFF800000> : vector<8xf32>
    %313 = vector.multi_reduction <maximumf>, %312, %cst_30 [1] : vector<8x23xf32> to vector<8xf32>
    %314 = vector.shape_cast %313 : vector<8xf32> to vector<8x1xf32>
    %315 = vector.broadcast %314 : vector<8x1xf32> to vector<8x23xf32>
    %316 = arith.subf %312, %315 : vector<8x23xf32>
    %317 = math.exp %316 : vector<8x23xf32>
    %cst_31 = arith.constant dense<0.000000e+00> : vector<8xf32>
    %318 = vector.multi_reduction <add>, %317, %cst_31 [1] : vector<8x23xf32> to vector<8xf32>
    %319 = vector.shape_cast %318 : vector<8xf32> to vector<8x1xf32>
    %320 = vector.broadcast %319 : vector<8x1xf32> to vector<8x23xf32>
    %321 = arith.divf %317, %320 : vector<8x23xf32>
    %c0_32 = arith.constant 0 : index
    %c0_33 = arith.constant 0 : index
    %322 = vector.load %arg5[%c0_32, %c0_33] : memref<8x23xf32, #tpu.memory_space<vmem>>, vector<8x23xf32>
    tpu.vector_store %arg5[%c0_32, %c0_33], %321 {strides = array<i32>} : memref<8x23xf32, #tpu.memory_space<vmem>>, vector<8x23xf32>,
    return
  }
}

</mosaic_0001>

<bundles_post_ra>
// kernel: inception_time_monitor_lstm.1
= control target key start
LH: loop header
LB: loop body
LE: loop exit
PB: predicated region body
PF: predicated region fallthrough
CT: control target
= control target key end

     0   :  { %10 = vsyncpa [#allocation3], 0  ;;  %s2107_s0 = inlined_call_operand.vmem [shape: f32[64,16], index: 0, kind: input, shape index: {}]   ;;  %s2108_s1 = inlined_call_operand.hbm [shape: bf16[16,128], index: 1, kind: input, shape index: {}]   ;;  %s2109_s2 = inlined_call_operand.hbm [shape: bf16[64,256], index: 2, kind: input, shape index: {}]   ;;  %s2110_s3 = inlined_call_operand.vmem [shape: bf16[288,128], index: 3, kind: input, shape index: {}]   ;;  %s2111_s4 = inlined_call_operand.hbm [shape: f32[5,128], index: 4, kind: input, shape index: {}]   ;;  %s2112_s5 = inlined_call_operand.hbm [shape: f32[8,23], index: 5, kind: output, shape index: {}]  }
   0x1   :  { %11 = vsyncpa [#allocation6], 0 }
   0x2   :  { %12 = vsyncpa [#allocation4], 0  ;;  %s1636_s18 = smov [#allocation5]   ;;  %s1542_s22 = scalar_lea.hbm %s2109_s2, 1024 }
   0x3   :  { %s32_s19 = sshll.u32 %s1636_s18, 4  ;;  %p1543_p0 = scmp.ne.s32.totalorder %s2109_s2, %s1542_s22  ;;  %s33_s19 = int_to_ptr.vmem [resolvable:$true] %s32_s19 }
   0x4   :  { %p1546_p1 = scmp.lt.u32.totalorder %s1542_s22, %s2109_s2 }
   0x6   :  { %p1548_p2 = pnand %p1546_p1, %p1543_p0 }
   0x8   :  { %1551 = shalt.err (!%p1548_p2)
}
   0x9   :  { %s1552_s27 = scalar_lea.vmem %s33_s19, 1024  ;;  %p1557_p4 = scmp.lt.s32.totalorder %s33_s19, %s33_s19 }
   0xa   :  { %p1553_p3 = scmp.ne.s32.totalorder %s33_s19, %s1552_s27  ;;  %p1558_p5 = scmp.lt.s32.totalorder %s1552_s27, %s1552_s27 }
   0xc   :  { %p1559_p6 = por %p1558_p5, %p1557_p4 }
   0xe   :  { %p1560_p7 = pnand %p1559_p6, %p1553_p3 }
  0x10   :  { %1563 = shalt.err (!%p1560_p7)
}
  0x11   :  { %s1637_s28 = smov 128   ;;  %s1638_s29 = smov 8  }
  0x12   :  { %38 = dma.hbm_to_vmem [thread:$0]  %s2109_s2, 1024, %s33_s19, [#allocation6], %s1637_s28, %s1637_s28, %s1638_s29  }
  0x13   :  { %s1639_s7 = smov [#allocation2]   ;;  %s1564_s11 = scalar_lea.hbm %s2108_s1, 128 }
  0x14   :  { %s20_s8 = sshll.u32 %s1639_s7, 4  ;;  %p1565_p8 = scmp.ne.s32.totalorder %s2108_s1, %s1564_s11  ;;  %s21_s8 = int_to_ptr.vmem [resolvable:$true] %s20_s8 }
  0x15   :  { %p1568_p9 = scmp.lt.u32.totalorder %s1564_s11, %s2108_s1 }
  0x17   :  { %p1570_p10 = pnand %p1568_p9, %p1565_p8 }
  0x19   :  { %1573 = shalt.err (!%p1570_p10)
}
  0x1a   :  { %s1574_s16 = scalar_lea.vmem %s21_s8, 128  ;;  %p1579_p12 = scmp.lt.s32.totalorder %s21_s8, %s21_s8 }
  0x1b   :  { %p1575_p11 = scmp.ne.s32.totalorder %s21_s8, %s1574_s16  ;;  %p1580_p13 = scmp.lt.s32.totalorder %s1574_s16, %s1574_s16 }
  0x1d   :  { %p1581_p0 = por %p1580_p13, %p1579_p12 }
  0x1f   :  { %p1582_p1 = pnand %p1581_p0, %p1575_p11 }
  0x21   :  { %1585 = shalt.err (!%p1582_p1)
}
  0x22   :  { %s1640_s2 = smov 64   ;;  %s1641_s17 = smov 4  }
  0x23   :  { %26 = dma.hbm_to_vmem [thread:$0]  %s2108_s1, 128, %s21_s8, [#allocation3], %s1640_s2, %s1640_s2, %s1641_s17  }
  0x24   :  { %s1642_s20 = smov [#allocation7]   ;;  %s1586_s24 = scalar_lea.hbm %s2111_s4, 128 }
  0x25   :  { %s47_s21 = sshll.u32 %s1642_s20, 4  ;;  %p1587_p2 = scmp.ne.s32.totalorder %s2111_s4, %s1586_s24  ;;  %s48_s21 = int_to_ptr.vmem [resolvable:$true] %s47_s21 }
  0x26   :  { %p1590_p3 = scmp.lt.u32.totalorder %s1586_s24, %s2111_s4 }
  0x28   :  { %p1592_p4 = pnand %p1590_p3, %p1587_p2 }
  0x2a   :  { %1595 = shalt.err (!%p1592_p4)
}
  0x2b   :  { %s1596_s29 = scalar_lea.vmem %s48_s21, 128  ;;  %p1601_p6 = scmp.lt.s32.totalorder %s48_s21, %s48_s21 }
  0x2c   :  { %p1597_p5 = scmp.ne.s32.totalorder %s48_s21, %s1596_s29  ;;  %p1602_p7 = scmp.lt.s32.totalorder %s1596_s29, %s1596_s29 }
  0x2e   :  { %p1603_p8 = por %p1602_p7, %p1601_p6 }
  0x30   :  { %p1604_p9 = pnand %p1603_p8, %p1597_p5 }
  0x32   :  { %1607 = shalt.err (!%p1604_p9)
}
  0x33   :  { %50 = dma.hbm_to_vmem [thread:$0]  %s2111_s4, 128, %s48_s21, [#allocation6]  }
  0x34   :  { %1630 = dma.done.wait [#allocation3], 128  }
  0x35   :  { %1631 = vsyncadd [#allocation3], 4294967168 }
  0x36   :  { %1632 = dma.done.wait [#allocation6], 1152  }
  0x37   :  { %1633 = vsyncadd [#allocation6], 4294966144  ;;  %v1442_v0 = vld [vmem:[#allocation2] sm:$0xff]   ;;  %v63_v2 = vld [vmem:[%s2107_s0 + $0x8] sm:$0xff]  ;;  %vm86_vm0 = vcmask 130048   ;;  %v76_v7 = vlaneseq  ;;  %v1643_v18 = vmov 0.5  }
  0x38   :  { %v62_v1 = vld [vmem:[%s2107_s0] sm:$0xff]  ;;  %v64_v3 = vld [vmem:[%s2107_s0 + $0x10] sm:$0xff]  ;;  %1371 = vmatprep.subr.bf16.mxu0 %v1442_v0  ;;  %v65_v5 = vld [vmem:[%s2107_s0 + $0x18] sm:$0xff]  ;;  %s1644_s13 = smov 32   ;;  %v1645_v38 = vmov 0   ;;  %vm207_vm4 = vcmask 261120  }
  0x39   :  { %v70_v4 = vpack.c.bf16 %v63_v2, %v62_v1  ;;  %1372 = vmatpush3.bf16.msra.mxu0 %v1442_v0  ;;  %v71_v6 = vpack.c.bf16 %v65_v5, %v64_v3  ;;  %v1731_v8 = vshrl.u32 %v76_v7, 7  ;;  %v1734_v10 = vld [vmem:[#allocation7] sm:$0x1f]  ;;  %v173_v14 = vand.u32 127, %v76_v7  ;;  %v1761_v31 = vld [vmem:[#allocation5 + $0x14] ss:$8 sps:$4 sm:$0xff]   ;;  %286 = vmatprep.mubr.bf16.mxu1 %v1645_v38 }
  0x3a   :  { %v1757_v29 = vld [vmem:[#allocation5 + $0x4] ss:$8 sps:$4 sm:$0xff]   ;;  %v1759_v30 = vld [vmem:[#allocation5] ss:$8 sps:$4 sm:$0xff]   ;;  %v1766_v32 = vld [vmem:[#allocation5 + $0x10] ss:$8 sps:$4 sm:$0xff]  }
  0x3b   :  { %1373 = vmatprep.mubr.msk.bf16.mxu0 %vm86_vm0, %v70_v4  ;;  %v78_v9 = vsub.s32 0, %v1731_v8  ;;  %vm174_vm1 = vcmp.ge.s32.totalorder %v173_v14, 64  ;;  %vm175_vm2 = vcmp.lt.s32.totalorder %v173_v14, 96  ;;  %254 = vmatprep.subr.bf16.mxu1 %v1757_v29  ;;  %v1770_v33 = vld [vmem:[#allocation5 + $0x24] ss:$8 sps:$4 sm:$0xff]   ;;  %vm250_vm5 = vcmask 523264  }
  0x3c   :  { %1374 = vmatmul.mubr.msk.bf16.vlgmr.msra.gmra.mrb[0].mxu0 %vm86_vm0, %v71_v6  ;;  %vm176_vm3 = vmand %vm174_vm1, %vm175_vm2  ;;  %350 = vmatprep.subr.bf16.mxu0 %v1757_v29  ;;  %v1774_v34 = vld [vmem:[#allocation5 + $0x20] ss:$8 sps:$4 sm:$0xff]   ;;  %v1778_v35 = vld [vmem:[#allocation5 + $0x34] ss:$8 sps:$4 sm:$0xff]   ;;  %v181_v44 = vsub.s32 1, %v1731_v8  ;;  %vm1647_vm6 = vmmov 0  }
  0x3d   :  { %v1737_v11 = vrot.slane %v1734_v10, %v78_v9  ;;  %v1746_v19 = vsel %vm176_vm3, 1.0, %v1643_v18  ;;  %v1748_v21 = vsel %vm176_vm3, 0.0, %v1643_v18  ;;  %255 = vmatpush1.bf16.msra.mxu1 %v1759_v30  ;;  %351 = vmatpush1.bf16.msra.mxu0 %v1759_v30  ;;  %v1786_v37 = vld [vmem:[#allocation5 + $0x30] ss:$8 sps:$4 sm:$0xff]   ;;  %v67_v6 = vld [vmem:[%s2107_s0 + $0x28] sm:$0xff]  ;;  %v68_v7 = vld [vmem:[%s2107_s0 + $0x30] sm:$0xff] }
  0x3e   :  { %256 = vmatprep.subr.bf16.mxu1 %v1761_v31  ;;  %352 = vmatprep.subr.bf16.mxu0 %v1761_v31  ;;  %v1807_v45 = vrot.slane %v1734_v10, %v181_v44  ;;  %v66_v5 = vld [vmem:[%s2107_s0 + $0x20] sm:$0xff]  ;;  %v69_v10 = vld [vmem:[%s2107_s0 + $0x38] sm:$0xff]  ;;  %vm1276_vm7 = vcmask 187392  }
  0x3f   :  { %v72_v9 = vpack.c.bf16 %v67_v6, %v66_v5 }
  0x41   :  { %257 = vmatpush1.bf16.msra.mxu1 %v1766_v32  ;;  %353 = vmatpush1.bf16.msra.mxu0 %v1766_v32 }
  0x42   :  { %258 = vmatprep.subr.bf16.mxu1 %v1770_v33  ;;  %354 = vmatprep.subr.bf16.mxu0 %v1770_v33 }
  0x43   :  { %1377 = vmatprep.mubr.msk.bf16.mxu0 %vm86_vm0, %v72_v9 }
  0x45   :  { %259 = vmatpush1.bf16.msra.mxu1 %v1774_v34  ;;  %355 = vmatpush1.bf16.msra.mxu0 %v1774_v34 }
  0x46   :  { %260 = vmatprep.subr.bf16.mxu1 %v1778_v35  ;;  %356 = vmatprep.subr.bf16.mxu0 %v1778_v35 }
  0x49   :  { %261 = vmatpush1.bf16.msra.mxu1 %v1786_v37  ;;  %357 = vmatpush1.bf16.msra.mxu0 %v1786_v37 }
  0x4a   :  { %446 = vmatprep.subr.bf16.mxu1 %v1757_v29  ;;  %542 = vmatprep.subr.bf16.mxu0 %v1757_v29 }
 0x10f   :  { %v1739_v12 = vpop.f32.mrb[0].mxu0 }
 0x110   :  { %v133_v13 = vpop.f32.mrb[1].mxu0 }
 0x111   :  { %v134_v15 = vadd.f32 %v133_v13, %v1737_v11  ;;  %v1742_v16 = vpop.f32.mrb[2].mxu0  ;;  %v73_v13 = vpack.c.bf16 %v69_v10, %v68_v7 }
 0x112   :  { %v1744_v17 = vpop.f32.mrb[3].mxu0  ;;  %v145_v10 = vadd.f32 %v1742_v16, %v1737_v11 }
 0x113   :  { %1473 = vtanh.f32 %v134_v15  ;;  %v137_v46 = vadd.f32 %v1744_v17, %v1737_v11  ;;  %1378 = vmatmul.mubr.msk.bf16.gmra.mrb[4].mxu0 %vm86_vm0, %v73_v13 }
 0x114   :  { %382 = vmatprep.mubr.bf16.mxu0 %v1645_v38 }
 0x11d   :  { %v1474_v20 = vpop.eup %1473 }
 0x11e   :  { %v184_v22 = vmul.f32 %v1474_v20, %v1746_v19 }
 0x120   :  { %v185_v23 = vadd.f32 %v184_v22, %v1748_v21 }
 0x122   :  { %188 = vrot.lane.b32.xlu0 %v185_v23, %s1640_s2  ;;  %v186_v26 = vmul.f32 0.0, %v185_v23 }
 0x194   :  { %v189_v24 = vpop.permute.xlu0 %188 }
 0x195   :  { %v191_v25 = vmul.f32 %v189_v24, %v185_v23 }
 0x197   :  { %193 = vrot.lane.b32.xlu0 %v191_v25, %s1644_s13 }
 0x209   :  { %v194_v27 = vpop.permute.xlu0 %193 }
 0x20a   :  { %v1754_v28 = vadd.f32 %v194_v27, %v186_v26 }
 0x20c   :  { %1475 = vtanh.f32 %v1754_v28 }
 0x216   :  { %v1476_v36 = vpop.eup %1475 }
 0x217   :  { %199 = vrot.lane.b32.xlu1 %v1476_v36, %s1640_s2 }
 0x289   :  { %v200_v39 = vpop.permute.xlu1 %199 }
 0x28a   :  { %v202_v40 = vmul.f32 %v200_v39, %v185_v23  ;;  %v1846_v23 = vpop.f32.mrb[4].mxu0 }
 0x28b   :  { %v1848_v24 = vpop.f32.mrb[5].mxu0 }
 0x28c   :  { %204 = vrot.lane.b32.xlu1 %v202_v40, %s1644_s13  ;;  %v1850_v25 = vpop.f32.mrb[6].mxu0  ;;  %v142_v40 = vadd.f32 %v1739_v12, %v1737_v11 }
 0x28d   :  { %v1852_v26 = vpop.f32.mrb[7].mxu0 }
 0x2fe   :  { %v205_v41 = vpop.permute.xlu1 %204 }
 0x2ff   :  { %v208_v42 = vsel %vm207_vm4, %v205_v41, 0.0 }
 0x300   :  { %v209_v43 = vpack.c.bf16 %v208_v42, %v208_v42 }
 0x302   :  { %1318 = vmatmul.mubr.msk.bf16.vlgmr.msra.gmra.mrb[0].mxu1 %vm250_vm5, %v209_v43 }
 0x303   :  { %447 = vmatpush1.bf16.msra.mxu1 %v1759_v30  ;;  %478 = vmatprep.mubr.bf16.mxu1 %v1645_v38 }
 0x304   :  { %448 = vmatprep.subr.bf16.mxu1 %v1761_v31 }
 0x307   :  { %449 = vmatpush1.bf16.msra.mxu1 %v1766_v32 }
 0x308   :  { %450 = vmatprep.subr.bf16.mxu1 %v1770_v33 }
 0x30b   :  { %451 = vmatpush1.bf16.msra.mxu1 %v1774_v34 }
 0x30c   :  { %452 = vmatprep.subr.bf16.mxu1 %v1778_v35 }
 0x30f   :  { %453 = vmatpush1.bf16.msra.mxu1 %v1786_v37 }
 0x310   :  { %638 = vmatprep.subr.bf16.mxu1 %v1757_v29 }
 0x3d5   :  { %v288_v47 = vpop.f32.mrb[0].mxu1 }
 0x3d6   :  { %v295_v48 = vadd.f32 %v288_v47, %v137_v46  ;;  %v290_v49 = vpop.f32.mrb[1].mxu1 }
 0x3d7   :  { %v316_v50 = vadd.f32 %v290_v49, %v1807_v45  ;;  %v292_v51 = vpop.f32.mrb[2].mxu1 }
 0x3d8   :  { %1477 = vtanh.f32 %v295_v48  ;;  %v293_v52 = vpop.f32.mrb[3].mxu1 }
 0x3d9   :  { %1479 = vtanh.f32 %v316_v50 }
 0x3e2   :  { %v1478_v53 = vpop.eup %1477 }
 0x3e3   :  { %v1480_v54 = vpop.eup %1479  ;;  %v297_v55 = vmul.f32 %v1478_v53, %v1746_v19 }
 0x3e4   :  { %v318_v56 = vmul.f32 %v1480_v54, %v1746_v19 }
 0x3e5   :  { %v298_v57 = vadd.f32 %v297_v55, %v1748_v21 }
 0x3e6   :  { %v319_v58 = vadd.f32 %v318_v56, %v1748_v21 }
 0x3e7   :  { %301 = vrot.lane.b32.xlu0 %v298_v57, %s1640_s2  ;;  %v299_v63 = vmul.f32 %v298_v57, %v1754_v28 }
 0x3e8   :  { %322 = vrot.lane.b32.xlu1 %v319_v58, %s1640_s2  ;;  %v320_v1 = vmul.f32 0.0, %v319_v58 }
 0x459   :  { %v302_v59 = vpop.permute.xlu0 %301 }
 0x45a   :  { %v304_v60 = vmul.f32 %v302_v59, %v298_v57  ;;  %v323_v61 = vpop.permute.xlu1 %322 }
 0x45b   :  { %v325_v62 = vmul.f32 %v323_v61, %v319_v58 }
 0x45c   :  { %306 = vrot.lane.b32.xlu0 %v304_v60, %s1644_s13 }
 0x45d   :  { %327 = vrot.lane.b32.xlu1 %v325_v62, %s1644_s13 }
 0x4ce   :  { %v307_v0 = vpop.permute.xlu0 %306 }
 0x4cf   :  { %v1821_v2 = vadd.f32 %v307_v0, %v299_v63  ;;  %v328_v3 = vpop.permute.xlu1 %327 }
 0x4d0   :  { %v1823_v4 = vadd.f32 %v328_v3, %v320_v1 }
 0x4d1   :  { %1481 = vtanh.f32 %v1821_v2 }
 0x4d2   :  { %1483 = vtanh.f32 %v1823_v4 }
 0x4db   :  { %v1482_v14 = vpop.eup %1481 }
 0x4dc   :  { %v1484_v15 = vpop.eup %1483  ;;  %312 = vrot.lane.b32.xlu0 %v1482_v14, %s1640_s2 }
 0x4dd   :  { %333 = vrot.lane.b32.xlu1 %v1484_v15, %s1640_s2 }
 0x54e   :  { %v313_v17 = vpop.permute.xlu0 %312 }
 0x54f   :  { %v315_v18 = vmul.f32 %v313_v17, %v298_v57  ;;  %v334_v20 = vpop.permute.xlu1 %333 }
 0x550   :  { %v336_v22 = vmul.f32 %v334_v20, %v319_v58 }
 0x551   :  { %338 = vrot.lane.b32.xlu0 %v315_v18, %s1644_s13 }
 0x552   :  { %342 = vrot.lane.b32.xlu1 %v336_v22, %s1640_s2 }
 0x5c3   :  { %v339_v27 = vpop.permute.xlu0 %338 }
 0x5c4   :  { %v343_v28 = vpop.permute.xlu1 %342 }
 0x5c5   :  { %v345_v36 = vsel %vm207_vm4, %v339_v27, %v343_v28 }
 0x5c6   :  { %v346_v39 = vpack.c.bf16 %v345_v36, %v345_v36 }
 0x5c8   :  { %1319 = vmatmul.mubr.msk.bf16.vlgmr.msra.gmra.mrb[8].mxu0 %vm250_vm5, %v346_v39 }
 0x5c9   :  { %543 = vmatpush1.bf16.msra.mxu0 %v1759_v30  ;;  %574 = vmatprep.mubr.bf16.mxu0 %v1645_v38 }
 0x5ca   :  { %544 = vmatprep.subr.bf16.mxu0 %v1761_v31 }
 0x5cd   :  { %545 = vmatpush1.bf16.msra.mxu0 %v1766_v32 }
 0x5ce   :  { %546 = vmatprep.subr.bf16.mxu0 %v1770_v33 }
 0x5d1   :  { %547 = vmatpush1.bf16.msra.mxu0 %v1774_v34 }
 0x5d2   :  { %548 = vmatprep.subr.bf16.mxu0 %v1778_v35 }
 0x5d5   :  { %549 = vmatpush1.bf16.msra.mxu0 %v1786_v37 }
 0x5d6   :  { %734 = vmatprep.subr.bf16.mxu0 %v1757_v29 }
 0x69b   :  { %v384_v41 = vpop.f32.mrb[8].mxu0 }
 0x69c   :  { %v391_v42 = vadd.f32 %v384_v41, %v142_v40  ;;  %v386_v43 = vpop.f32.mrb[9].mxu0 }
 0x69d   :  { %v412_v44 = vadd.f32 %v386_v43, %v1807_v45  ;;  %v388_v46 = vpop.f32.mrb[10].mxu0 }
 0x69e   :  { %1485 = vtanh.f32 %v391_v42  ;;  %v389_v47 = vpop.f32.mrb[11].mxu0 }
 0x69f   :  { %1487 = vtanh.f32 %v412_v44 }
 0x6a8   :  { %v1486_v48 = vpop.eup %1485 }
 0x6a9   :  { %v1488_v49 = vpop.eup %1487  ;;  %v393_v50 = vmul.f32 %v1486_v48, %v1746_v19 }
 0x6aa   :  { %v414_v51 = vmul.f32 %v1488_v49, %v1746_v19 }
 0x6ab   :  { %v394_v52 = vadd.f32 %v393_v50, %v1748_v21 }
 0x6ac   :  { %v415_v53 = vadd.f32 %v414_v51, %v1748_v21 }
 0x6ad   :  { %397 = vrot.lane.b32.xlu0 %v394_v52, %s1640_s2  ;;  %v395_v57 = vmul.f32 %v394_v52, %v1821_v2 }
 0x6ae   :  { %418 = vrot.lane.b32.xlu1 %v415_v53, %s1640_s2  ;;  %v416_v59 = vmul.f32 %v415_v53, %v1823_v4 }
 0x71f   :  { %v398_v12 = vpop.permute.xlu0 %397 }
 0x720   :  { %v400_v54 = vmul.f32 %v398_v12, %v394_v52  ;;  %v419_v55 = vpop.permute.xlu1 %418 }
 0x721   :  { %v421_v56 = vmul.f32 %v419_v55, %v415_v53 }
 0x722   :  { %402 = vrot.lane.b32.xlu0 %v400_v54, %s1644_s13 }
 0x723   :  { %423 = vrot.lane.b32.xlu1 %v421_v56, %s1644_s13 }
 0x794   :  { %v403_v58 = vpop.permute.xlu0 %402 }
 0x795   :  { %v405_v60 = vadd.f32 %v403_v58, %v395_v57  ;;  %v424_v61 = vpop.permute.xlu1 %423 }
 0x796   :  { %v426_v62 = vadd.f32 %v424_v61, %v416_v59 }
 0x797   :  { %1489 = vtanh.f32 %v405_v60 }
 0x798   :  { %1491 = vtanh.f32 %v426_v62 }
 0x7a1   :  { %v1490_v63 = vpop.eup %1489 }
 0x7a2   :  { %v1492_v0 = vpop.eup %1491  ;;  %408 = vrot.lane.b32.xlu0 %v1490_v63, %s1640_s2 }
 0x7a3   :  { %429 = vrot.lane.b32.xlu1 %v1492_v0, %s1640_s2 }
 0x814   :  { %v409_v1 = vpop.permute.xlu0 %408 }
 0x815   :  { %v411_v3 = vmul.f32 %v409_v1, %v394_v52  ;;  %v430_v5 = vpop.permute.xlu1 %429 }
 0x816   :  { %v432_v6 = vmul.f32 %v430_v5, %v415_v53 }
 0x817   :  { %434 = vrot.lane.b32.xlu0 %v411_v3, %s1644_s13 }
 0x818   :  { %438 = vrot.lane.b32.xlu1 %v432_v6, %s1640_s2 }
 0x889   :  { %v435_v2 = vpop.permute.xlu0 %434 }
 0x88a   :  { %v439_v4 = vpop.permute.xlu1 %438 }
 0x88b   :  { %v441_v7 = vsel %vm207_vm4, %v435_v2, %v439_v4 }
 0x88c   :  { %v442_v9 = vpack.c.bf16 %v441_v7, %v441_v7 }
 0x88e   :  { %1320 = vmatmul.mubr.msk.bf16.vlgmr.msra.gmra.mrb[4].mxu1 %vm250_vm5, %v442_v9 }
 0x88f   :  { %639 = vmatpush1.bf16.msra.mxu1 %v1759_v30  ;;  %670 = vmatprep.mubr.bf16.mxu1 %v1645_v38 }
 0x890   :  { %640 = vmatprep.subr.bf16.mxu1 %v1761_v31 }
 0x893   :  { %641 = vmatpush1.bf16.msra.mxu1 %v1766_v32 }
 0x894   :  { %642 = vmatprep.subr.bf16.mxu1 %v1770_v33 }
 0x897   :  { %643 = vmatpush1.bf16.msra.mxu1 %v1774_v34 }
 0x898   :  { %644 = vmatprep.subr.bf16.mxu1 %v1778_v35 }
 0x89b   :  { %645 = vmatpush1.bf16.msra.mxu1 %v1786_v37 }
 0x89c   :  { %830 = vmatprep.subr.bf16.mxu1 %v1757_v29 }
 0x961   :  { %v480_v13 = vpop.f32.mrb[4].mxu1 }
 0x962   :  { %v487_v14 = vadd.f32 %v480_v13, %v145_v10  ;;  %v482_v15 = vpop.f32.mrb[5].mxu1 }
 0x963   :  { %v508_v17 = vadd.f32 %v482_v15, %v1807_v45  ;;  %v484_v18 = vpop.f32.mrb[6].mxu1 }
 0x964   :  { %1493 = vtanh.f32 %v487_v14  ;;  %v485_v20 = vpop.f32.mrb[7].mxu1 }
 0x965   :  { %1495 = vtanh.f32 %v508_v17 }
 0x96e   :  { %v1494_v22 = vpop.eup %1493 }
 0x96f   :  { %v1496_v27 = vpop.eup %1495  ;;  %v489_v28 = vmul.f32 %v1494_v22, %v1746_v19 }
 0x970   :  { %v510_v36 = vmul.f32 %v1496_v27, %v1746_v19 }
 0x971   :  { %v490_v39 = vadd.f32 %v489_v28, %v1748_v21 }
 0x972   :  { %v511_v40 = vadd.f32 %v510_v36, %v1748_v21 }
 0x973   :  { %493 = vrot.lane.b32.xlu0 %v490_v39, %s1640_s2  ;;  %v491_v44 = vmul.f32 %v490_v39, %v405_v60  ;;  %v150_v60 = vadd.f32 %v1848_v24, %v1737_v11 }
 0x974   :  { %514 = vrot.lane.b32.xlu1 %v511_v40, %s1640_s2  ;;  %v512_v47 = vmul.f32 %v511_v40, %v426_v62 }
 0x9e5   :  { %v494_v16 = vpop.permute.xlu0 %493 }
 0x9e6   :  { %v496_v41 = vmul.f32 %v494_v16, %v490_v39  ;;  %v515_v42 = vpop.permute.xlu1 %514 }
 0x9e7   :  { %v517_v43 = vmul.f32 %v515_v42, %v511_v40 }
 0x9e8   :  { %498 = vrot.lane.b32.xlu0 %v496_v41, %s1644_s13 }
 0x9e9   :  { %519 = vrot.lane.b32.xlu1 %v517_v43, %s1644_s13 }
 0xa5a   :  { %v499_v46 = vpop.permute.xlu0 %498 }
 0xa5b   :  { %v501_v48 = vadd.f32 %v499_v46, %v491_v44  ;;  %v520_v49 = vpop.permute.xlu1 %519  ;;  %v153_v46 = vadd.f32 %v1852_v26, %v1737_v11 }
 0xa5c   :  { %v522_v50 = vadd.f32 %v520_v49, %v512_v47 }
 0xa5d   :  { %1497 = vtanh.f32 %v501_v48 }
 0xa5e   :  { %1499 = vtanh.f32 %v522_v50 }
 0xa67   :  { %v1498_v51 = vpop.eup %1497 }
 0xa68   :  { %v1500_v52 = vpop.eup %1499  ;;  %504 = vrot.lane.b32.xlu0 %v1498_v51, %s1640_s2 }
 0xa69   :  { %525 = vrot.lane.b32.xlu1 %v1500_v52, %s1640_s2 }
 0xada   :  { %v505_v53 = vpop.permute.xlu0 %504 }
 0xadb   :  { %v507_v12 = vmul.f32 %v505_v53, %v490_v39  ;;  %v526_v54 = vpop.permute.xlu1 %525 }
 0xadc   :  { %v528_v55 = vmul.f32 %v526_v54, %v511_v40 }
 0xadd   :  { %530 = vrot.lane.b32.xlu0 %v507_v12, %s1644_s13 }
 0xade   :  { %534 = vrot.lane.b32.xlu1 %v528_v55, %s1640_s2 }
 0xb4f   :  { %v531_v56 = vpop.permute.xlu0 %530 }
 0xb50   :  { %v535_v57 = vpop.permute.xlu1 %534 }
 0xb51   :  { %v537_v58 = vsel %vm207_vm4, %v531_v56, %v535_v57 }
 0xb52   :  { %v538_v59 = vpack.c.bf16 %v537_v58, %v537_v58 }
 0xb54   :  { %1321 = vmatmul.mubr.msk.bf16.vlgmr.msra.gmra.mrb[12].mxu0 %vm250_vm5, %v538_v59 }
 0xb55   :  { %735 = vmatpush1.bf16.msra.mxu0 %v1759_v30  ;;  %766 = vmatprep.mubr.bf16.mxu0 %v1645_v38 }
 0xb56   :  { %736 = vmatprep.subr.bf16.mxu0 %v1761_v31 }
 0xb59   :  { %737 = vmatpush1.bf16.msra.mxu0 %v1766_v32 }
 0xb5a   :  { %738 = vmatprep.subr.bf16.mxu0 %v1770_v33 }
 0xb5d   :  { %739 = vmatpush1.bf16.msra.mxu0 %v1774_v34 }
 0xb5e   :  { %740 = vmatprep.subr.bf16.mxu0 %v1778_v35 }
 0xb61   :  { %741 = vmatpush1.bf16.msra.mxu0 %v1786_v37 }
 0xb62   :  { %926 = vmatprep.subr.bf16.mxu0 %v1757_v29 }
 0xc27   :  { %v576_v61 = vpop.f32.mrb[12].mxu0 }
 0xc28   :  { %v583_v62 = vadd.f32 %v576_v61, %v150_v60  ;;  %v578_v63 = vpop.f32.mrb[13].mxu0 }
 0xc29   :  { %v604_v0 = vadd.f32 %v578_v63, %v1807_v45  ;;  %v580_v1 = vpop.f32.mrb[14].mxu0 }
 0xc2a   :  { %1501 = vtanh.f32 %v583_v62  ;;  %v581_v3 = vpop.f32.mrb[15].mxu0 }
 0xc2b   :  { %1503 = vtanh.f32 %v604_v0 }
 0xc34   :  { %v1502_v5 = vpop.eup %1501 }
 0xc35   :  { %v1504_v6 = vpop.eup %1503  ;;  %v585_v2 = vmul.f32 %v1502_v5, %v1746_v19 }
 0xc36   :  { %v606_v4 = vmul.f32 %v1504_v6, %v1746_v19 }
 0xc37   :  { %v586_v29 = vadd.f32 %v585_v2, %v1748_v21 }
 0xc38   :  { %v607_v7 = vadd.f32 %v606_v4, %v1748_v21 }
 0xc39   :  { %589 = vrot.lane.b32.xlu0 %v586_v29, %s1640_s2  ;;  %v587_v14 = vmul.f32 %v586_v29, %v501_v48 }
 0xc3a   :  { %610 = vrot.lane.b32.xlu1 %v607_v7, %s1640_s2  ;;  %v608_v17 = vmul.f32 %v607_v7, %v522_v50 }
 0xcab   :  { %v590_v24 = vpop.permute.xlu0 %589 }
 0xcac   :  { %v592_v9 = vmul.f32 %v590_v24, %v586_v29  ;;  %v611_v10 = vpop.permute.xlu1 %610 }
 0xcad   :  { %v613_v13 = vmul.f32 %v611_v10, %v607_v7 }
 0xcae   :  { %594 = vrot.lane.b32.xlu0 %v592_v9, %s1644_s13 }
 0xcaf   :  { %615 = vrot.lane.b32.xlu1 %v613_v13, %s1644_s13 }
 0xd20   :  { %v595_v15 = vpop.permute.xlu0 %594 }
 0xd21   :  { %v597_v18 = vadd.f32 %v595_v15, %v587_v14  ;;  %v616_v20 = vpop.permute.xlu1 %615  ;;  %v158_v14 = vadd.f32 %v1846_v23, %v1737_v11 }
 0xd22   :  { %v618_v22 = vadd.f32 %v616_v20, %v608_v17 }
 0xd23   :  { %1505 = vtanh.f32 %v597_v18 }
 0xd24   :  { %1507 = vtanh.f32 %v618_v22 }
 0xd2d   :  { %v1506_v27 = vpop.eup %1505 }
 0xd2e   :  { %v1508_v28 = vpop.eup %1507  ;;  %600 = vrot.lane.b32.xlu0 %v1506_v27, %s1640_s2 }
 0xd2f   :  { %621 = vrot.lane.b32.xlu1 %v1508_v28, %s1640_s2 }
 0xda0   :  { %v601_v36 = vpop.permute.xlu0 %600 }
 0xda1   :  { %v603_v39 = vmul.f32 %v601_v36, %v586_v29  ;;  %v622_v40 = vpop.permute.xlu1 %621 }
 0xda2   :  { %v624_v16 = vmul.f32 %v622_v40, %v607_v7 }
 0xda3   :  { %626 = vrot.lane.b32.xlu0 %v603_v39, %s1644_s13 }
 0xda4   :  { %630 = vrot.lane.b32.xlu1 %v624_v16, %s1640_s2 }
 0xe15   :  { %v627_v41 = vpop.permute.xlu0 %626 }
 0xe16   :  { %v631_v42 = vpop.permute.xlu1 %630 }
 0xe17   :  { %v633_v43 = vsel %vm207_vm4, %v627_v41, %v631_v42 }
 0xe18   :  { %v634_v44 = vpack.c.bf16 %v633_v43, %v633_v43 }
 0xe1a   :  { %1322 = vmatmul.mubr.msk.bf16.vlgmr.msra.gmra.mrb[8].mxu1 %vm250_vm5, %v634_v44 }
 0xe1b   :  { %831 = vmatpush1.bf16.msra.mxu1 %v1759_v30  ;;  %862 = vmatprep.mubr.bf16.mxu1 %v1645_v38 }
 0xe1c   :  { %832 = vmatprep.subr.bf16.mxu1 %v1761_v31 }
 0xe1f   :  { %833 = vmatpush1.bf16.msra.mxu1 %v1766_v32 }
 0xe20   :  { %834 = vmatprep.subr.bf16.mxu1 %v1770_v33 }
 0xe23   :  { %835 = vmatpush1.bf16.msra.mxu1 %v1774_v34 }
 0xe24   :  { %836 = vmatprep.subr.bf16.mxu1 %v1778_v35 }
 0xe27   :  { %837 = vmatpush1.bf16.msra.mxu1 %v1786_v37 }
 0xeed   :  { %v672_v47 = vpop.f32.mrb[8].mxu1 }
 0xeee   :  { %v679_v48 = vadd.f32 %v672_v47, %v153_v46  ;;  %v674_v49 = vpop.f32.mrb[9].mxu1 }
 0xeef   :  { %v700_v50 = vadd.f32 %v674_v49, %v1807_v45  ;;  %v676_v51 = vpop.f32.mrb[10].mxu1 }
 0xef0   :  { %1509 = vtanh.f32 %v679_v48  ;;  %v677_v52 = vpop.f32.mrb[11].mxu1 }
 0xef1   :  { %1511 = vtanh.f32 %v700_v50 }
 0xefa   :  { %v1510_v53 = vpop.eup %1509 }
 0xefb   :  { %v1512_v12 = vpop.eup %1511  ;;  %v681_v54 = vmul.f32 %v1510_v53, %v1746_v19 }
 0xefc   :  { %v702_v55 = vmul.f32 %v1512_v12, %v1746_v19  ;;  %v161_v12 = vadd.f32 %v1850_v25, %v1737_v11 }
 0xefd   :  { %v682_v56 = vadd.f32 %v681_v54, %v1748_v21 }
 0xefe   :  { %v703_v57 = vadd.f32 %v702_v55, %v1748_v21 }
 0xeff   :  { %685 = vrot.lane.b32.xlu0 %v682_v56, %s1640_s2  ;;  %v683_v61 = vmul.f32 %v682_v56, %v597_v18 }
 0xf00   :  { %706 = vrot.lane.b32.xlu1 %v703_v57, %s1640_s2  ;;  %v704_v63 = vmul.f32 %v703_v57, %v618_v22 }
 0xf71   :  { %v686_v26 = vpop.permute.xlu0 %685 }
 0xf72   :  { %v688_v58 = vmul.f32 %v686_v26, %v682_v56  ;;  %v707_v59 = vpop.permute.xlu1 %706 }
 0xf73   :  { %v709_v60 = vmul.f32 %v707_v59, %v703_v57 }
 0xf74   :  { %690 = vrot.lane.b32.xlu0 %v688_v58, %s1644_s13 }
 0xf75   :  { %711 = vrot.lane.b32.xlu1 %v709_v60, %s1644_s13 }
 0xfe6   :  { %v691_v62 = vpop.permute.xlu0 %690 }
 0xfe7   :  { %v693_v0 = vadd.f32 %v691_v62, %v683_v61  ;;  %v712_v1 = vpop.permute.xlu1 %711 }
 0xfe8   :  { %v714_v3 = vadd.f32 %v712_v1, %v704_v63 }
 0xfe9   :  { %1513 = vtanh.f32 %v693_v0 }
 0xfea   :  { %1515 = vtanh.f32 %v714_v3 }
 0xff3   :  { %v1514_v5 = vpop.eup %1513 }
 0xff4   :  { %v1516_v6 = vpop.eup %1515  ;;  %696 = vrot.lane.b32.xlu0 %v1514_v5, %s1640_s2 }
 0xff5   :  { %717 = vrot.lane.b32.xlu1 %v1516_v6, %s1640_s2 }
0x1066   :  { %v697_v2 = vpop.permute.xlu0 %696 }
0x1067   :  { %v699_v4 = vmul.f32 %v697_v2, %v682_v56  ;;  %v718_v29 = vpop.permute.xlu1 %717 }
0x1068   :  { %v720_v7 = vmul.f32 %v718_v29, %v703_v57 }
0x1069   :  { %722 = vrot.lane.b32.xlu0 %v699_v4, %s1644_s13 }
0x106a   :  { %726 = vrot.lane.b32.xlu1 %v720_v7, %s1640_s2 }
0x10db   :  { %v723_v24 = vpop.permute.xlu0 %722 }
0x10dc   :  { %v727_v9 = vpop.permute.xlu1 %726 }
0x10dd   :  { %v729_v10 = vsel %vm207_vm4, %v723_v24, %v727_v9 }
0x10de   :  { %v730_v13 = vpack.c.bf16 %v729_v10, %v729_v10 }
0x10e0   :  { %1323 = vmatmul.mubr.msk.bf16.vlgmr.msra.gmra.mrb[16].mxu0 %vm250_vm5, %v730_v13 }
0x10e1   :  { %927 = vmatpush1.bf16.msra.mxu0 %v1759_v30  ;;  %958 = vmatprep.mubr.bf16.mxu0 %v1645_v38 }
0x10e2   :  { %928 = vmatprep.subr.bf16.mxu0 %v1761_v31 }
0x10e5   :  { %929 = vmatpush1.bf16.msra.mxu0 %v1766_v32 }
0x10e6   :  { %930 = vmatprep.subr.bf16.mxu0 %v1770_v33 }
0x10e9   :  { %931 = vmatpush1.bf16.msra.mxu0 %v1774_v34 }
0x10ea   :  { %932 = vmatprep.subr.bf16.mxu0 %v1778_v35 }
0x10ed   :  { %933 = vmatpush1.bf16.msra.mxu0 %v1786_v37 }
0x11b3   :  { %v768_v15 = vpop.f32.mrb[16].mxu0 }
0x11b4   :  { %v775_v17 = vadd.f32 %v768_v15, %v158_v14  ;;  %v770_v30 = vpop.f32.mrb[17].mxu0 }
0x11b5   :  { %v796_v38 = vadd.f32 %v770_v30, %v1807_v45  ;;  %v772_v18 = vpop.f32.mrb[18].mxu0 }
0x11b6   :  { %1517 = vtanh.f32 %v775_v17  ;;  %v773_v31 = vpop.f32.mrb[19].mxu0 }
0x11b7   :  { %1519 = vtanh.f32 %v796_v38 }
0x11c0   :  { %v1518_v32 = vpop.eup %1517 }
0x11c1   :  { %v1520_v33 = vpop.eup %1519  ;;  %v777_v34 = vmul.f32 %v1518_v32, %v1746_v19 }
0x11c2   :  { %v798_v35 = vmul.f32 %v1520_v33, %v1746_v19 }
0x11c3   :  { %v778_v37 = vadd.f32 %v777_v34, %v1748_v21 }
0x11c4   :  { %v799_v20 = vadd.f32 %v798_v35, %v1748_v21 }
0x11c5   :  { %781 = vrot.lane.b32.xlu0 %v778_v37, %s1640_s2  ;;  %v779_v36 = vmul.f32 %v778_v37, %v693_v0 }
0x11c6   :  { %802 = vrot.lane.b32.xlu1 %v799_v20, %s1640_s2  ;;  %v800_v40 = vmul.f32 %v799_v20, %v714_v3 }
0x1237   :  { %v782_v23 = vpop.permute.xlu0 %781 }
0x1238   :  { %v784_v22 = vmul.f32 %v782_v23, %v778_v37  ;;  %v803_v27 = vpop.permute.xlu1 %802 }
0x1239   :  { %v805_v28 = vmul.f32 %v803_v27, %v799_v20 }
0x123a   :  { %786 = vrot.lane.b32.xlu0 %v784_v22, %s1644_s13 }
0x123b   :  { %807 = vrot.lane.b32.xlu1 %v805_v28, %s1644_s13 }
0x12ac   :  { %v787_v39 = vpop.permute.xlu0 %786 }
0x12ad   :  { %v789_v16 = vadd.f32 %v787_v39, %v779_v36  ;;  %v808_v41 = vpop.permute.xlu1 %807 }
0x12ae   :  { %v810_v42 = vadd.f32 %v808_v41, %v800_v40  ;;  %v1646_v40 = vmov 0.0   ;;  %v1458_v41 = vld [vmem:[%s2110_s3 + $0x18] sm:$0xff]  }
0x12af   :  { %1521 = vtanh.f32 %v789_v16  ;;  %1381 = vmatprep.subr.bf16.mxu1 %v1646_v40  ;;  %1389 = vmatprep.subr.bf16.mxu0 %v1646_v40 }
0x12b0   :  { %1523 = vtanh.f32 %v810_v42 }
0x12b9   :  { %v1522_v43 = vpop.eup %1521 }
0x12ba   :  { %v1524_v44 = vpop.eup %1523  ;;  %792 = vrot.lane.b32.xlu0 %v1522_v43, %s1640_s2 }
0x12bb   :  { %813 = vrot.lane.b32.xlu1 %v1524_v44, %s1640_s2 }
0x132c   :  { %v793_v46 = vpop.permute.xlu0 %792 }
0x132d   :  { %v795_v47 = vmul.f32 %v793_v46, %v778_v37  ;;  %v814_v48 = vpop.permute.xlu1 %813  ;;  %v1460_v46 = vld [vmem:[%s2110_s3 + $0x28] sm:$0xff]  }
0x132e   :  { %v816_v49 = vmul.f32 %v814_v48, %v799_v20  ;;  %v1461_v48 = vld [vmem:[%s2110_s3 + $0x30] sm:$0xff]  }
0x132f   :  { %818 = vrot.lane.b32.xlu0 %v795_v47, %s1644_s13 }
0x1330   :  { %822 = vrot.lane.b32.xlu1 %v816_v49, %s1640_s2  ;;  %v1462_v49 = vld [vmem:[%s2110_s3 + $0x38] sm:$0xff]  }
0x13a1   :  { %v819_v50 = vpop.permute.xlu0 %818 }
0x13a2   :  { %v823_v51 = vpop.permute.xlu1 %822 }
0x13a3   :  { %v825_v52 = vsel %vm207_vm4, %v819_v50, %v823_v51  ;;  %v1463_v51 = vld [vmem:[%s2110_s3 + $0x40] sm:$0xff]  }
0x13a4   :  { %v826_v53 = vpack.c.bf16 %v825_v52, %v825_v52  ;;  %v1464_v52 = vld [vmem:[%s2110_s3 + $0x48] sm:$0xff]  }
0x13a6   :  { %1324 = vmatmul.mubr.msk.bf16.vlgmr.msra.gmra.mrb[12].mxu1 %vm250_vm5, %v826_v53  ;;  %v1465_v53 = vld [vmem:[%s2110_s3 + $0x50] sm:$0xff]  }
0x13a7   :  { %1385 = vmatprep.mubr.msk.bf16.mxu1 %vm1647_vm6, %v1646_v40 }
0x1479   :  { %v864_v54 = vpop.f32.mrb[12].mxu1 }
0x147a   :  { %v871_v55 = vadd.f32 %v864_v54, %v161_v12  ;;  %v866_v56 = vpop.f32.mrb[13].mxu1  ;;  %v1466_v12 = vld [vmem:[%s2110_s3 + $0x58] sm:$0xff]   ;;  %v1467_v54 = vld [vmem:[%s2110_s3 + $0x60] sm:$0xff]  }
0x147b   :  { %v892_v57 = vadd.f32 %v866_v56, %v1807_v45  ;;  %v868_v26 = vpop.f32.mrb[14].mxu1  ;;  %v1469_v56 = vld [vmem:[%s2110_s3 + $0x70] sm:$0xff]  }
0x147c   :  { %1525 = vtanh.f32 %v871_v55  ;;  %v869_v58 = vpop.f32.mrb[15].mxu1  ;;  %v1468_v55 = vld [vmem:[%s2110_s3 + $0x68] sm:$0xff]   ;;  %v1026_v26 = vsub.s32 2, %v1731_v8 }
0x147d   :  { %1527 = vtanh.f32 %v892_v57  ;;  %v1470_v57 = vld [vmem:[%s2110_s3 + $0x78] sm:$0xff]   ;;  %v1541_v58 = vld [vmem:[#allocation7] sm:$0x1f] }
0x1486   :  { %v1526_v59 = vpop.eup %1525 }
0x1487   :  { %v1528_v60 = vpop.eup %1527  ;;  %v873_v61 = vmul.f32 %v1526_v59, %v1746_v19  ;;  %v1027_v59 = vrot.slane %v1541_v58, %v1026_v26 }
0x1488   :  { %v894_v62 = vmul.f32 %v1528_v60, %v1746_v19 }
0x1489   :  { %v874_v63 = vadd.f32 %v873_v61, %v1748_v21 }
0x148a   :  { %v895_v0 = vadd.f32 %v894_v62, %v1748_v21 }
0x148b   :  { %877 = vrot.lane.b32.xlu0 %v874_v63, %s1640_s2  ;;  %v875_v5 = vmul.f32 %v874_v63, %v789_v16  ;;  %v1457_v16 = vld [vmem:[%s2110_s3 + $0x10] sm:$0xff]  }
0x148c   :  { %898 = vrot.lane.b32.xlu1 %v895_v0, %s1640_s2  ;;  %v896_v2 = vmul.f32 %v895_v0, %v810_v42  ;;  %v1459_v42 = vld [vmem:[%s2110_s3 + $0x20] sm:$0xff]  }
0x14fd   :  { %v878_v11 = vpop.permute.xlu0 %877 }
0x14fe   :  { %v880_v25 = vmul.f32 %v878_v11, %v874_v63  ;;  %v899_v1 = vpop.permute.xlu1 %898 }
0x14ff   :  { %v901_v3 = vmul.f32 %v899_v1, %v895_v0  ;;  %v1471_v1 = vld [vmem:[%s2110_s3 + $0x80] sm:$0xff]  }
0x1500   :  { %882 = vrot.lane.b32.xlu0 %v880_v25, %s1644_s13 }
0x1501   :  { %903 = vrot.lane.b32.xlu1 %v901_v3, %s1644_s13  ;;  %v1472_v3 = vld [vmem:[%s2110_s3 + $0x88] sm:$0xff]  }
0x1572   :  { %v883_v6 = vpop.permute.xlu0 %882 }
0x1573   :  { %v885_v4 = vadd.f32 %v883_v6, %v875_v5  ;;  %v904_v29 = vpop.permute.xlu1 %903  ;;  %v1090_v5 = vsub.s32 3, %v1731_v8 }
0x1574   :  { %v906_v7 = vadd.f32 %v904_v29, %v896_v2 }
0x1575   :  { %1529 = vtanh.f32 %v885_v4  ;;  %v1091_v6 = vrot.slane %v1541_v58, %v1090_v5 }
0x1576   :  { %1531 = vtanh.f32 %v906_v7 }
0x157f   :  { %v1530_v24 = vpop.eup %1529 }
0x1580   :  { %v1532_v9 = vpop.eup %1531  ;;  %888 = vrot.lane.b32.xlu0 %v1530_v24, %s1640_s2 }
0x1581   :  { %909 = vrot.lane.b32.xlu1 %v1532_v9, %s1640_s2 }
0x15f2   :  { %v889_v10 = vpop.permute.xlu0 %888 }
0x15f3   :  { %v891_v13 = vmul.f32 %v889_v10, %v874_v63  ;;  %v910_v14 = vpop.permute.xlu1 %909 }
0x15f4   :  { %v912_v15 = vmul.f32 %v910_v14, %v895_v0 }
0x15f5   :  { %914 = vrot.lane.b32.xlu0 %v891_v13, %s1644_s13  ;;  %v1272_v13 = vsub.s32 4, %v1731_v8 }
0x15f6   :  { %918 = vrot.lane.b32.xlu1 %v912_v15, %s1640_s2 }
0x15f7   :  { %v1273_v14 = vrot.slane %v1541_v58, %v1272_v13 }
0x1667   :  { %v915_v17 = vpop.permute.xlu0 %914 }
0x1668   :  { %v919_v30 = vpop.permute.xlu1 %918 }
0x1669   :  { %v921_v38 = vsel %vm207_vm4, %v915_v17, %v919_v30 }
0x166a   :  { %v922_v18 = vpack.c.bf16 %v921_v38, %v921_v38 }
0x166c   :  { %1325 = vmatmul.mubr.msk.bf16.vlgmr.msra.gmra.mrb[20].mxu0 %vm250_vm5, %v922_v18 }
0x166d   :  { %1405 = vmatprep.mubr.msk.bf16.mxu0 %vm1647_vm6, %v1646_v40  ;;  %1390 = vmatpush3.bf16.msra.mxu0 %v1457_v16 }
0x166e   :  { %1391 = vmatprep.subr.bf16.mxu0 %v1646_v40 }
0x1671   :  { %1392 = vmatpush3.bf16.msra.mxu0 %v1458_v41 }
0x1672   :  { %1393 = vmatprep.subr.bf16.mxu0 %v1646_v40 }
0x1675   :  { %1394 = vmatpush3.bf16.msra.mxu0 %v1459_v42 }
0x1676   :  { %1395 = vmatprep.subr.bf16.mxu0 %v1646_v40 }
0x1679   :  { %1396 = vmatpush3.bf16.msra.mxu0 %v1460_v46 }
0x167a   :  { %1397 = vmatprep.subr.bf16.mxu0 %v1646_v40 }
0x167d   :  { %1398 = vmatpush3.bf16.msra.mxu0 %v1461_v48 }
0x167e   :  { %1399 = vmatprep.subr.bf16.mxu0 %v1646_v40 }
0x1681   :  { %1400 = vmatpush3.bf16.msra.mxu0 %v1462_v49 }
0x1682   :  { %1401 = vmatprep.subr.bf16.mxu0 %v1646_v40 }
0x1685   :  { %1402 = vmatpush3.bf16.msra.mxu0 %v1463_v51 }
0x1686   :  { %1403 = vmatprep.subr.bf16.mxu0 %v1646_v40 }
0x1689   :  { %1404 = vmatpush3.bf16.msra.mxu0 %v1464_v52 }
0x173f   :  { %v960_v31 = vpop.f32.mrb[20].mxu0 }
0x1740   :  { %v961_v32 = vpop.f32.mrb[21].mxu0 }
0x1741   :  { %v966_v33 = vadd.f32 %v961_v32, %v1807_v45  ;;  %v963_v34 = vpop.f32.mrb[22].mxu0  ;;  %v1455_v45 = vld [vmem:[%s2110_s3] sm:$0xff]  }
0x1742   :  { %v964_v35 = vpop.f32.mrb[23].mxu0  ;;  %1382 = vmatpush3.bf16.msra.mxu1 %v1455_v45 }
0x1743   :  { %1533 = vtanh.f32 %v966_v33  ;;  %1383 = vmatprep.subr.bf16.mxu1 %v1646_v40 }
0x174d   :  { %v1534_v37 = vpop.eup %1533 }
0x174e   :  { %v968_v20 = vmul.f32 %v1534_v37, %v1746_v19  ;;  %v1456_v19 = vld [vmem:[%s2110_s3 + $0x8] sm:$0xff]   ;;  %s1648_s3 = smov [#allocation8]  }
0x174f   :  { %1384 = vmatpush3.bf16.msra.mxu1 %v1456_v19  ;;  %s1295_s28 = sshll.u32 %s1648_s3, 4  ;;  %s1296_s28 = int_to_ptr.vmem [resolvable:$true] %s1295_s28 }
0x1750   :  { %v969_v23 = vadd.f32 %v968_v20, %v1748_v21  ;;  %1409 = vmatprep.subr.bf16.mxu1 %v1646_v40  ;;  %s1608_s29 = scalar_lea.vmem %s1296_s28, 128  ;;  %p1613_p11 = scmp.lt.s32.totalorder %s1296_s28, %s1296_s28 }
0x1751   :  { %p1609_p10 = scmp.ne.s32.totalorder %s1296_s28, %s1608_s29  ;;  %p1614_p12 = scmp.lt.s32.totalorder %s1608_s29, %s1608_s29 }
0x1752   :  { %972 = vrot.lane.b32.xlu0 %v969_v23, %s1640_s2  ;;  %v970_v28 = vmul.f32 %v969_v23, %v906_v7 }
0x1753   :  { %p1615_p13 = por %p1614_p12, %p1613_p11 }
0x1755   :  { %p1616_p0 = pnand %p1615_p13, %p1609_p10 }
0x17c4   :  { %v973_v22 = vpop.permute.xlu0 %972 }
0x17c5   :  { %v975_v27 = vmul.f32 %v973_v22, %v969_v23 }
0x17c7   :  { %977 = vrot.lane.b32.xlu1 %v975_v27, %s1644_s13 }
0x1839   :  { %v978_v36 = vpop.permute.xlu1 %977 }
0x183a   :  { %v980_v39 = vadd.f32 %v978_v36, %v970_v28 }
0x183c   :  { %1535 = vtanh.f32 %v980_v39 }
0x1846   :  { %v1536_v21 = vpop.eup %1535 }
0x1847   :  { %983 = vrot.lane.b32.xlu0 %v1536_v21, %s1640_s2 }
0x18b9   :  { %v984_v43 = vpop.permute.xlu0 %983 }
0x18ba   :  { %v986_v44 = vmul.f32 %v984_v43, %v969_v23 }
0x18bc   :  { %v1023_v47 = vpack.c.bf16 %v986_v44, %v986_v44 }
0x18be   :  { %1029 = vrot.lane.b32.xlu1 %v1023_v47, %s1644_s13 }
0x1930   :  { %v1030_v50 = vpop.permute.xlu1 %1029 }
0x1931   :  { %1386 = vmatmul.mubr.msk.bf16.vlgmr.msra.gmra.mrb[16].mxu1 %vm207_vm4, %v1030_v50 }
0x1932   :  { %1425 = vmatprep.mubr.msk.bf16.mxu1 %vm1647_vm6, %v1646_v40  ;;  %1410 = vmatpush3.bf16.msra.mxu1 %v1465_v53 }
0x1933   :  { %1411 = vmatprep.subr.bf16.mxu1 %v1646_v40 }
0x1936   :  { %1412 = vmatpush3.bf16.msra.mxu1 %v1466_v12 }
0x1937   :  { %1413 = vmatprep.subr.bf16.mxu1 %v1646_v40 }
0x193a   :  { %1414 = vmatpush3.bf16.msra.mxu1 %v1467_v54 }
0x193b   :  { %1415 = vmatprep.subr.bf16.mxu1 %v1646_v40 }
0x193e   :  { %1416 = vmatpush3.bf16.msra.mxu1 %v1468_v55 }
0x193f   :  { %1417 = vmatprep.subr.bf16.mxu1 %v1646_v40 }
0x1942   :  { %1418 = vmatpush3.bf16.msra.mxu1 %v1469_v56 }
0x1943   :  { %1419 = vmatprep.subr.bf16.mxu1 %v1646_v40 }
0x1946   :  { %1420 = vmatpush3.bf16.msra.mxu1 %v1470_v57 }
0x1947   :  { %1421 = vmatprep.subr.bf16.mxu1 %v1646_v40 }
0x194a   :  { %1422 = vmatpush3.bf16.msra.mxu1 %v1471_v1 }
0x194b   :  { %1423 = vmatprep.subr.bf16.mxu1 %v1646_v40 }
0x194e   :  { %1424 = vmatpush3.bf16.msra.mxu1 %v1472_v3 }
0x1a04   :  { %v1080_v60 = vpop.f32.mrb[16].mxu1 }
0x1a05   :  { %v1081_v61 = vadd.f32 %v1080_v60, %v1027_v59  ;;  %v1387_v62 = vpop.f32.mrb[17].mxu1 }
0x1a06   :  { %v1083_v63 = vpop.f32.mrb[18].mxu1 }
0x1a07   :  { %v1086_v0 = vmax.f32 %v1081_v61, 0.0  ;;  %v1388_v11 = vpop.f32.mrb[19].mxu1 }
0x1a09   :  { %v1087_v25 = vpack.c.bf16 %v1086_v0, %v1086_v0 }
0x1a0b   :  { %1406 = vmatmul.mubr.bf16.vlgmr.msra.gmra.mrb[24].mxu0 %v1087_v25 }
0x1ade   :  { %v1174_v2 = vpop.f32.mrb[24].mxu0 }
0x1adf   :  { %v1175_v4 = vadd.f32 %v1174_v2, %v1091_v6  ;;  %v1407_v29 = vpop.f32.mrb[25].mxu0 }
0x1ae0   :  { %v1177_v7 = vpop.f32.mrb[26].mxu0 }
0x1ae1   :  { %v1180_v24 = vmax.f32 %v1175_v4, 0.0  ;;  %v1408_v9 = vpop.f32.mrb[27].mxu0 }
0x1ae3   :  { %v1181_v10 = vpack.c.bf16 %v1180_v24, %v1180_v24 }
0x1ae5   :  { %1426 = vmatmul.mubr.bf16.vlgmr.msra.gmra.mrb[20].mxu1 %v1181_v10 }
0x1bb8   :  { %v1264_v15 = vpop.f32.mrb[20].mxu1 }
0x1bb9   :  { %v1274_v17 = vadd.f32 %v1273_v14, %v1264_v15  ;;  %v1427_v30 = vpop.f32.mrb[21].mxu1 }
0x1bba   :  { %v1267_v38 = vpop.f32.mrb[22].mxu1 }
0x1bbb   :  { %v1275_v18 = vmax.f32 %v1274_v17, 0.0  ;;  %v1428_v31 = vpop.f32.mrb[23].mxu1 }
0x1bbd   :  { %v1277_v32 = vsel %vm1276_vm7, %v1275_v18, -inf }
0x1bbe   :  { %1278 = vmax.xlane.f32.xlu0 %v1277_v32 }
0x1c4b   :  { %v1279_v33 = vpop.xlane.xlu0 %1278 }
0x1c4c   :  { %v1280_v34 = vsub.f32 %v1275_v18, %v1279_v33 }
0x1c4e   :  { %v1281_v35 = vmul.f32 1.442695, %v1280_v34 }
0x1c50   :  { %1537 = vpow2.f32 %v1281_v35 }
0x1c5a   :  { %v1538_v37 = vpop.eup %1537 }
0x1c5b   :  { %v1283_v20 = vsel %vm1276_vm7, %v1538_v37, 0.0 }
0x1c5c   :  { %1284 = vadd.xlane.f32.xlu1 %v1283_v20 }
0x1ce9   :  { %v1285_v8 = vpop.xlane.xlu1 %1284 }
0x1cea   :  { %1539 = vrcp.f32 %v1285_v8 }
0x1cf4   :  { %v1540_v23 = vpop.eup %1539 }
0x1cf5   :  { %v1287_v22 = vmul.f32 %v1540_v23, %v1538_v37 }
0x1cf7   :  { %1288 = vst.msk [vmem:[#allocation8] sm:$0xff] %vm1276_vm7, %v1287_v22 }
0x1cf8   :  { %1619 = shalt.err (!%p1616_p0)
}
0x1cf9   :  { %s1620_s30 = scalar_lea.hbm %s2112_s5, 128 }
0x1cfa   :  { %p1621_p1 = scmp.ne.s32.totalorder %s2112_s5, %s1620_s30  ;;  %p1624_p2 = scmp.lt.u32.totalorder %s1620_s30, %s2112_s5 }
0x1cfc   :  { %p1626_p3 = pnand %p1624_p2, %p1621_p1 }
0x1cfe   :  { %1629 = shalt.err (!%p1626_p3)
}
0x1cff   :  { %1298 = dma.vmem_to_hbm [thread:$0]  %s1296_s28, 128, %s2112_s5, [#allocation4]  }
0x1d00   :  { %1634 = dma.done.wait [#allocation4], 128  }
0x1d01   :  { %1635 = vsyncadd [#allocation4], 4294967168 }
0x1d02   :  { %1302 = vsyncpa [#allocation3], 1 }
0x1d03   :  { %1303 = vsyncpa [#allocation6], 1 }
0x1d04   :  { %1304 = vsyncpa [#allocation4], 1 }

</bundles_post_ra>
